<compile_context>
chip_gen: v7x
topology: tpu7x:2x2x1
jax: 0.10.0
libtpu: 0.0.40
codegen_flags: <defaults>
</compile_context>

<pallas_src>
import functools
import math

import jax
import jax.numpy as jnp
from jax import lax
from jax.experimental import pallas as pl
from jax.experimental.pallas import tpu as pltpu

_MXU_DTYPE = jnp.bfloat16   # MXU operand dtype (accumulation is always f32)
_LN_EPS = 1e-5


# ---------------------------------------------------------------------------
# In-kernel helpers
# ---------------------------------------------------------------------------

def _mm(a, b):
    """a @ b on the MXU; operands are already bf16, f32 accumulation."""
    return lax.dot_general(a, b, (((a.ndim - 1,), (0,)), ((), ())),
                           preferred_element_type=jnp.float32)


def _mm_nt(a, b):
    """a @ b.T without materializing a transpose (contract last dims)."""
    return lax.dot_general(a, b, (((a.ndim - 1,), (b.ndim - 1,)), ((), ())),
                           preferred_element_type=jnp.float32)


def _layernorm(h, g, b):
    """LayerNorm over the last dim; h f32, g/b (1, D) f32."""
    mean = jnp.mean(h, axis=-1, keepdims=True)
    hc = h - mean
    var = jnp.mean(hc * hc, axis=-1, keepdims=True)
    return hc * lax.rsqrt(var + _LN_EPS) * g + b


def _add_layernorm(x, res, g, b):
    return _layernorm((x + res).astype(jnp.float32), g, b)


def _attn_head(q, k, v):
    """One head; q/k/v bf16 (Tq,dh)/(Tk,dh)/(Tk,dh); scale pre-folded into q.

    Returns f32 (Tq, dh).  The softmax denominator is applied to the small
    (Tq, dh) output via an approx reciprocal (EUP slot), not to the (Tq, Tk)
    probability matrix.
    """
    s = _mm_nt(q, k)                                     # (Tq, Tk) f32
    m = jnp.max(s, axis=-1, keepdims=True)
    p = jnp.exp(s - m)
    denom = jnp.sum(p, axis=-1, keepdims=True)
    o = _mm(p.astype(q.dtype), v)                        # (Tq, dh) f32
    return o * pl.reciprocal(denom, approx=True)


def _multihead(q_all_bf, kv_all_bf, wo_ref, bo_ref, nhead, dh):
    """q_all_bf: (Tq, H*dh) bf16; kv_all_bf: (Tk, 2*H*dh) bf16 laid out
    [K heads | V heads].  Head merge = one (Tq, D) @ (D, D) projection."""
    d = nhead * dh
    heads = []
    for h in range(nhead):                               # unrolled (score/PV only)
        q = q_all_bf[:, h * dh:(h + 1) * dh]
        k = kv_all_bf[:, h * dh:(h + 1) * dh]
        v = kv_all_bf[:, d + h * dh:d + (h + 1) * dh]
        heads.append(_attn_head(q, k, v))
    attn = jnp.concatenate(heads, axis=-1).astype(_MXU_DTYPE)   # (Tq, D)
    return _mm(attn, wo_ref[...]) + bo_ref[...]                  # (Tq, D) f32


# ---------------------------------------------------------------------------
# Fused whole-decoder kernel: grid = (batch, layer)
# ---------------------------------------------------------------------------

def _decoder_kernel(
    x_ref, mem_ref,
    sa_wqkv, sa_bqkv, sa_wo, sa_bo,
    ca_wq, ca_bq, ca_wkv, ca_bkv, ca_wo, ca_bo,
    w1, b1, w2, b2,
    ln1_g, ln1_b, ln2_g, ln2_b, ln3_g, ln3_b,
    fn_g, fn_b,
    out_ref,
    mem_scr,
    *, nhead, num_layers, apply_final_ln):
    l = pl.program_id(1)
    d = x_ref.shape[-1]
    s = mem_ref.shape[0]
    dh = d // nhead

    # First layer step for this batch element: load activations into their
    # VMEM-resident homes.  out_ref stays resident across the layer axis
    # (same block index for all l); the running memory lives in an f32 scratch
    # and never returns to HBM.
    @pl.when(l == 0)
    def _():
        out_ref[...] = x_ref[...]
        mem_scr[...] = mem_ref[...].astype(jnp.float32)

    x = out_ref[...].astype(jnp.float32)     # (T, D) previous layer output
    mem = mem_scr[...]                       # (S, D) running memory, f32
    x_bf = x.astype(_MXU_DTYPE)              # cast once, reused by all projections
    mem_bf = mem.astype(_MXU_DTYPE)

    # ---- self-attention: fused (D, 3D) QKV projection, heads sliced in VMEM
    qkv = _mm(x_bf, sa_wqkv[...]) + sa_bqkv[...]                  # (T, 3D) f32
    qkv_bf = qkv.astype(_MXU_DTYPE)
    sa = _multihead(qkv_bf[:, :d], qkv_bf[:, d:], sa_wo, sa_bo, nhead, dh)
    x = _add_layernorm(x, sa, ln1_g[...], ln1_b[...])
    x_bf = x.astype(_MXU_DTYPE)

    # ---- cross-attention: (D, D) Q + fused (D, 2D) KV projections ----------
    q_all = (_mm(x_bf, ca_wq[...]) + ca_bq[...]).astype(_MXU_DTYPE)     # (T, D)
    kv_all = (_mm(mem_bf, ca_wkv[...]) + ca_bkv[...]).astype(_MXU_DTYPE)  # (S, 2D)
    ca = _multihead(q_all, kv_all, ca_wo, ca_bo, nhead, dh)
    x = _add_layernorm(x, ca, ln2_g[...], ln2_b[...])
    x_bf = x.astype(_MXU_DTYPE)

    # ---- feed-forward -------------------------------------------------------
    h = jnp.maximum(_mm(x_bf, w1[...]) + b1[...], 0.0)            # (T, Dff) f32
    ff = _mm(h.astype(_MXU_DTYPE), w2[...]) + b2[...]             # (T, D) f32
    y = _add_layernorm(x, ff, ln3_g[...], ln3_b[...])             # (T, D) f32

    out_ref[...] = y.astype(out_ref.dtype)

    # ---- fused misplace_add: memory <- memory + [y[1:]; 0] (seq axis) -------
    # Only rows [0, S-2] change (last row adds zero): one masked sublane store.
    mem_scr[pl.ds(0, s - 1), :] = mem[: s - 1] + y[1:]

    if apply_final_ln:
        @pl.when(l == num_layers - 1)
        def _():
            z = out_ref[...].astype(jnp.float32)
            out_ref[...] = _layernorm(z, fn_g[...], fn_b[...]).astype(out_ref.dtype)


def decoder_forward(tgt_btd, mem_btd, stacked, norm_g, norm_b, *, nhead,
                    num_layers, apply_final_ln):
    """tgt_btd/mem_btd: (B, T, D)/(B, S, D) batch-first.  Returns (B, T, D)."""
    B, T, D = tgt_btd.shape
    S = mem_btd.shape[1]
    # misplace_add adds the (seq-shifted) layer output to `memory`; the
    # reference semantics require matching sequence lengths.
    assert S == T, "misplace_add requires memory seq length == target seq length"

    fn_g = norm_g.reshape(1, D).astype(jnp.float32)
    fn_b = norm_b.reshape(1, D).astype(jnp.float32)

    def tok_spec(seq):
        return pl.BlockSpec((pl.Squeezed(), seq, D), lambda b, l: (b, 0, 0))

    def layer_spec(w):
        nd = w.ndim
        return pl.BlockSpec((pl.Squeezed(),) + w.shape[1:],
                            lambda b, l: (l,) + (0,) * (nd - 1))

    def const_spec(w):
        nd = w.ndim
        return pl.BlockSpec(w.shape, lambda b, l: (0,) * nd)

    kernel = functools.partial(_decoder_kernel, nhead=nhead,
                               num_layers=num_layers,
                               apply_final_ln=apply_final_ln)
    return pl.pallas_call(
        kernel,
        out_shape=jax.ShapeDtypeStruct((B, T, D), tgt_btd.dtype),
        grid=(B, num_layers),
        in_specs=[tok_spec(T), tok_spec(S)]
                 + [layer_spec(w) for w in stacked]
                 + [const_spec(fn_g), const_spec(fn_b)],
        out_specs=tok_spec(T),
        scratch_shapes=[pltpu.VMEM((S, D), jnp.float32)],
        compiler_params=pltpu.CompilerParams(
            dimension_semantics=("parallel", "arbitrary"),
            # Headroom under v7x's 64 MiB physical VMEM; raises the 16/32 MiB
            # scoped defaults on v5e/v6e for when weights grow past toy size.
            vmem_limit_bytes=48 * 1024 * 1024),
    )(tgt_btd, mem_btd, *stacked, fn_g, fn_b)


# ---------------------------------------------------------------------------
# Model glue
# ---------------------------------------------------------------------------

def my_transformer_decoder(tgt, memory, stacked_params, norm_g, norm_b,
                           nhead, num_layers,
                           Time_done=None, Last=None, Repeat=None,
                           tgt_att_mask=None, memory_att_mask=None,
                           tgt_key_padding_mask=None,
                           memory_key_padding_mask=None,
                           apply_final_norm=True):
    del Time_done, Last, Repeat                     # see TODO(synk) at top
    assert tgt_att_mask is None and memory_att_mask is None
    assert tgt_key_padding_mask is None and memory_key_padding_mask is None

    # Batch-first internally: a single transpose at entry/exit; no per-layer
    # HBM relayouts (the layer loop lives inside one pallas_call).
    out = decoder_forward(jnp.transpose(tgt, (1, 0, 2)),
                          jnp.transpose(memory, (1, 0, 2)),
                          stacked_params, norm_g, norm_b,
                          nhead=nhead, num_layers=num_layers,
                          apply_final_ln=apply_final_norm)
    return jnp.transpose(out, (1, 0, 2))            # back to (T, B, D)


# ---------------------------------------------------------------------------
# Parameter init (xavier_uniform weights, zero biases) + kernel-layout prep
# ---------------------------------------------------------------------------

def _xavier(key, shape):
    fan_in, fan_out = shape
    limit = math.sqrt(6.0 / (fan_in + fan_out))
    return jax.random.uniform(key, shape, jnp.float32, -limit, limit)


def _init_attn_params(key, d_model):
    ks = jax.random.split(key, 4)
    z = jnp.zeros((d_model,), jnp.float32)
    return {"wq": _xavier(ks[0], (d_model, d_model)), "bq": z,
            "wk": _xavier(ks[1], (d_model, d_model)), "bk": z,
            "wv": _xavier(ks[2], (d_model, d_model)), "bv": z,
            "wo": _xavier(ks[3], (d_model, d_model)), "bo": z}


def init_decoder_layer_params(key, d_model, d_ff):
    ks = jax.random.split(key, 4)
    D = d_model
    ones = jnp.ones((D,), jnp.float32)
    zeros = jnp.zeros((D,), jnp.float32)
    return {
        "self_attn": _init_attn_params(ks[0], D),
        "cross_attn": _init_attn_params(ks[1], D),
        "w1": _xavier(ks[2], (D, d_ff)), "b1": jnp.zeros((d_ff,), jnp.float32),
        "w2": _xavier(ks[3], (d_ff, D)), "b2": zeros,
        "ln1_g": ones, "ln1_b": zeros,
        "ln2_g": ones, "ln2_b": zeros,
        "ln3_g": ones, "ln3_b": zeros,
    }


def prepare_decoder_params(layer_params, nhead, mxu_dtype=_MXU_DTYPE):
    """Stack per-layer params along a leading layer axis for the fused kernel.

    - self-attn Q/K/V fused into one (D, 3D) weight, cross-attn K/V into one
      (D, 2D) weight (head columns stay contiguous so heads can be sliced
      from the projected activations in VMEM);
    - the 1/sqrt(dh) attention scale is folded into the Q weights/biases;
    - matmul weights stored bf16-at-rest; biases / LN params kept f32.
    """
    d = layer_params[0]["self_attn"]["wq"].shape[0]
    scale = 1.0 / math.sqrt(d // nhead)

    def row(v):
        return v.reshape(1, -1).astype(jnp.float32)

    def one(p):
        sa, ca = p["self_attn"], p["cross_attn"]
        return (
            jnp.concatenate([sa["wq"] * scale, sa["wk"], sa["wv"]],
                            axis=1).astype(mxu_dtype),                 # sa_wqkv
            row(jnp.concatenate([sa["bq"] * scale, sa["bk"], sa["bv"]])),  # sa_bqkv
            sa["wo"].astype(mxu_dtype), row(sa["bo"]),                 # sa_wo, sa_bo
            (ca["wq"] * scale).astype(mxu_dtype), row(ca["bq"] * scale),   # ca_wq, ca_bq
            jnp.concatenate([ca["wk"], ca["wv"]], axis=1).astype(mxu_dtype),  # ca_wkv
            row(jnp.concatenate([ca["bk"], ca["bv"]])),                # ca_bkv
            ca["wo"].astype(mxu_dtype), row(ca["bo"]),                 # ca_wo, ca_bo
            p["w1"].astype(mxu_dtype), row(p["b1"]),
            p["w2"].astype(mxu_dtype), row(p["b2"]),
            row(p["ln1_g"]), row(p["ln1_b"]),
            row(p["ln2_g"]), row(p["ln2_b"]),
            row(p["ln3_g"]), row(p["ln3_b"]),
        )

    per_layer = [one(p) for p in layer_params]
    return tuple(jnp.stack([pl_[i] for pl_ in per_layer], axis=0)
                 for i in range(len(per_layer[0])))


if __name__ == "__main__":
    T, B, D = 8, 2, 32          # seq=8, batch=2, hidden=32
    NHEAD, DFF = 4, 64
    NUM_LAYERS = 2

    root = jax.random.PRNGKey(0)
    k_tgt, k_mem, k_par = jax.random.split(root, 3)
    tgt = jax.random.normal(k_tgt, (T, B, D), jnp.float32)
    memory = jax.random.normal(k_mem, (T, B, D), jnp.float32)

    # _get_clones deep-copies the SAME initialized layer -> identical params.
    one_layer = init_decoder_layer_params(k_par, D, DFF)
    stacked = prepare_decoder_params([one_layer] * NUM_LAYERS, NHEAD)
    norm_g = jnp.ones((D,), jnp.float32)
    norm_b = jnp.zeros((D,), jnp.float32)

    fwd = jax.jit(functools.partial(
        my_transformer_decoder, nhead=NHEAD, num_layers=NUM_LAYERS))
    out = fwd(tgt, memory, stacked, norm_g, norm_b,
              Time_done=0, Last=False, Repeat=False)
    jax.block_until_ready(out)
    assert out.shape == (T, B, D)
    assert bool(jnp.all(jnp.isfinite(out)))
    print("KERNEL_OK")
</pallas_src>

<mosaic_0001>
module attributes {stable_mosaic.version = 11 : i64} {
  func.func @_decoder_kernel(%arg0: i32, %arg1: i32, %arg2: memref<1x8x32xf32, #tpu.memory_space<vmem>>, %arg3: memref<1x8x32xf32, #tpu.memory_space<vmem>>, %arg4: memref<1x32x96xbf16, #tpu.memory_space<vmem>>, %arg5: memref<1x1x96xf32, #tpu.memory_space<vmem>>, %arg6: memref<1x32x32xbf16, #tpu.memory_space<vmem>>, %arg7: memref<1x1x32xf32, #tpu.memory_space<vmem>>, %arg8: memref<1x32x32xbf16, #tpu.memory_space<vmem>>, %arg9: memref<1x1x32xf32, #tpu.memory_space<vmem>>, %arg10: memref<1x32x64xbf16, #tpu.memory_space<vmem>>, %arg11: memref<1x1x64xf32, #tpu.memory_space<vmem>>, %arg12: memref<1x32x32xbf16, #tpu.memory_space<vmem>>, %arg13: memref<1x1x32xf32, #tpu.memory_space<vmem>>, %arg14: memref<1x32x64xbf16, #tpu.memory_space<vmem>>, %arg15: memref<1x1x64xf32, #tpu.memory_space<vmem>>, %arg16: memref<1x64x32xbf16, #tpu.memory_space<vmem>>, %arg17: memref<1x1x32xf32, #tpu.memory_space<vmem>>, %arg18: memref<1x1x32xf32, #tpu.memory_space<vmem>>, %arg19: memref<1x1x32xf32, #tpu.memory_space<vmem>>, %arg20: memref<1x1x32xf32, #tpu.memory_space<vmem>>, %arg21: memref<1x1x32xf32, #tpu.memory_space<vmem>>, %arg22: memref<1x1x32xf32, #tpu.memory_space<vmem>>, %arg23: memref<1x1x32xf32, #tpu.memory_space<vmem>>, %arg24: memref<1x32xf32, #tpu.memory_space<vmem>>, %arg25: memref<1x32xf32, #tpu.memory_space<vmem>>, %arg26: memref<1x8x32xf32, #tpu.memory_space<vmem>>, %arg27: memref<8x32xf32, #tpu.memory_space<vmem>>) attributes {dimension_semantics = [#tpu.dimension_semantics<parallel>, #tpu.dimension_semantics<arbitrary>], iteration_bounds = array<i64: 2, 2>, scalar_prefetch = 0 : i64, scratch_operands = 1 : i64, tpu.core_type = #tpu.core_type<tc>, window_params = [{transform_indices = @transform_0, window_bounds = array<i64: 1, 8, 32>}, {transform_indices = @transform_1, window_bounds = array<i64: 1, 8, 32>}, {transform_indices = @transform_2, window_bounds = array<i64: 1, 32, 96>}, {transform_indices = @transform_3, window_bounds = array<i64: 1, 1, 96>}, {transform_indices = @transform_4, window_bounds = array<i64: 1, 32, 32>}, {transform_indices = @transform_5, window_bounds = array<i64: 1, 1, 32>}, {transform_indices = @transform_6, window_bounds = array<i64: 1, 32, 32>}, {transform_indices = @transform_7, window_bounds = array<i64: 1, 1, 32>}, {transform_indices = @transform_8, window_bounds = array<i64: 1, 32, 64>}, {transform_indices = @transform_9, window_bounds = array<i64: 1, 1, 64>}, {transform_indices = @transform_10, window_bounds = array<i64: 1, 32, 32>}, {transform_indices = @transform_11, window_bounds = array<i64: 1, 1, 32>}, {transform_indices = @transform_12, window_bounds = array<i64: 1, 32, 64>}, {transform_indices = @transform_13, window_bounds = array<i64: 1, 1, 64>}, {transform_indices = @transform_14, window_bounds = array<i64: 1, 64, 32>}, {transform_indices = @transform_15, window_bounds = array<i64: 1, 1, 32>}, {transform_indices = @transform_16, window_bounds = array<i64: 1, 1, 32>}, {transform_indices = @transform_17, window_bounds = array<i64: 1, 1, 32>}, {transform_indices = @transform_18, window_bounds = array<i64: 1, 1, 32>}, {transform_indices = @transform_19, window_bounds = array<i64: 1, 1, 32>}, {transform_indices = @transform_20, window_bounds = array<i64: 1, 1, 32>}, {transform_indices = @transform_21, window_bounds = array<i64: 1, 1, 32>}, {pipeline_mode = #tpu.pipeline_mode<synchronous>, transform_indices = @transform_22, window_bounds = array<i64: 1, 32>}, {pipeline_mode = #tpu.pipeline_mode<synchronous>, transform_indices = @transform_23, window_bounds = array<i64: 1, 32>}, {transform_indices = @transform_24, window_bounds = array<i64: 1, 8, 32>}]} {
    %c0_i32 = arith.constant 0 : i32
    %0 = arith.cmpi eq, %arg1, %c0_i32 : i32
    %1 = arith.extui %0 : i1 to i32
    %c0_i32_0 = arith.constant 0 : i32
    %2 = arith.cmpi ne, %1, %c0_i32_0 : i32
    scf.if %2 {
      %c0_125 = arith.constant 0 : index
      %c0_126 = arith.constant 0 : index
      %c0_127 = arith.constant 0 : index
      %284 = vector.load %arg2[%c0_125, %c0_126, %c0_127] : memref<1x8x32xf32, #tpu.memory_space<vmem>>, vector<1x8x32xf32>
      %285 = vector.shape_cast %284 : vector<1x8x32xf32> to vector<8x32xf32>
      %c0_128 = arith.constant 0 : index
      %c0_129 = arith.constant 0 : index
      %c0_130 = arith.constant 0 : index
      %286 = vector.load %arg26[%c0_128, %c0_129, %c0_130] : memref<1x8x32xf32, #tpu.memory_space<vmem>>, vector<1x8x32xf32>
      %287 = vector.shape_cast %286 : vector<1x8x32xf32> to vector<8x32xf32>
      %288 = vector.shape_cast %285 : vector<8x32xf32> to vector<1x8x32xf32>
      tpu.vector_store %arg26[%c0_128, %c0_129, %c0_130], %288 {strides = array<i32>} : memref<1x8x32xf32, #tpu.memory_space<vmem>>, vector<1x8x32xf32>,
      %c0_131 = arith.constant 0 : index
      %c0_132 = arith.constant 0 : index
      %c0_133 = arith.constant 0 : index
      %289 = vector.load %arg3[%c0_131, %c0_132, %c0_133] : memref<1x8x32xf32, #tpu.memory_space<vmem>>, vector<1x8x32xf32>
      %290 = vector.shape_cast %289 : vector<1x8x32xf32> to vector<8x32xf32>
      %c0_134 = arith.constant 0 : index
      %c0_135 = arith.constant 0 : index
      %291 = vector.load %arg27[%c0_134, %c0_135] : memref<8x32xf32, #tpu.memory_space<vmem>>, vector<8x32xf32>
      tpu.vector_store %arg27[%c0_134, %c0_135], %290 {strides = array<i32>} : memref<8x32xf32, #tpu.memory_space<vmem>>, vector<8x32xf32>,
    } else {
    }
    %c0 = arith.constant 0 : index
    %c0_1 = arith.constant 0 : index
    %c0_2 = arith.constant 0 : index
    %3 = vector.load %arg26[%c0, %c0_1, %c0_2] : memref<1x8x32xf32, #tpu.memory_space<vmem>>, vector<1x8x32xf32>
    %4 = vector.shape_cast %3 : vector<1x8x32xf32> to vector<8x32xf32>
    %c0_3 = arith.constant 0 : index
    %c0_4 = arith.constant 0 : index
    %5 = vector.load %arg27[%c0_3, %c0_4] : memref<8x32xf32, #tpu.memory_space<vmem>>, vector<8x32xf32>
    %6 = arith.truncf %4 : vector<8x32xf32> to vector<8x32xbf16>
    %7 = arith.truncf %5 : vector<8x32xf32> to vector<8x32xbf16>
    %c0_5 = arith.constant 0 : index
    %c0_6 = arith.constant 0 : index
    %c0_7 = arith.constant 0 : index
    %8 = vector.load %arg4[%c0_5, %c0_6, %c0_7] : memref<1x32x96xbf16, #tpu.memory_space<vmem>>, vector<1x32x96xbf16>
    %9 = vector.shape_cast %8 : vector<1x32x96xbf16> to vector<32x96xbf16>
    %cst = arith.constant dense<0.000000e+00> : vector<8x96xf32>
    %10 = tpu.matmul %6, %9, %cst {dimension_numbers = #tpu.dot_dimension_numbers<[1], [0], [0], [1], [0, 0, 1, 1], [], []>} : vector<8x32xbf16>, vector<32x96xbf16>, vector<8x96xf32> -> vector<8x96xf32>
    %c0_8 = arith.constant 0 : index
    %c0_9 = arith.constant 0 : index
    %c0_10 = arith.constant 0 : index
    %11 = vector.load %arg5[%c0_8, %c0_9, %c0_10] : memref<1x1x96xf32, #tpu.memory_space<vmem>>, vector<1x1x96xf32>
    %12 = vector.shape_cast %11 : vector<1x1x96xf32> to vector<1x96xf32>
    %13 = vector.broadcast %12 : vector<1x96xf32> to vector<8x96xf32>
    %14 = arith.addf %10, %13 : vector<8x96xf32>
    %15 = arith.truncf %14 : vector<8x96xf32> to vector<8x96xbf16>
    %16 = vector.extract_strided_slice %15 {offsets = [0, 0], sizes = [8, 32], strides = [1, 1]} : vector<8x96xbf16> to vector<8x32xbf16>
    %17 = vector.extract_strided_slice %15 {offsets = [0, 32], sizes = [8, 64], strides = [1, 1]} : vector<8x96xbf16> to vector<8x64xbf16>
    %18 = vector.extract_strided_slice %16 {offsets = [0, 0], sizes = [8, 8], strides = [1, 1]} : vector<8x32xbf16> to vector<8x8xbf16>
    %19 = vector.extract_strided_slice %17 {offsets = [0, 0], sizes = [8, 8], strides = [1, 1]} : vector<8x64xbf16> to vector<8x8xbf16>
    %20 = vector.extract_strided_slice %17 {offsets = [0, 32], sizes = [8, 8], strides = [1, 1]} : vector<8x64xbf16> to vector<8x8xbf16>
    %cst_11 = arith.constant dense<0.000000e+00> : vector<8x8xf32>
    %21 = tpu.matmul %18, %19, %cst_11 {dimension_numbers = #tpu.dot_dimension_numbers<[1], [1], [0], [0], [0, 0, 1, 0], [], []>} : vector<8x8xbf16>, vector<8x8xbf16>, vector<8x8xf32> -> vector<8x8xf32>
    %cst_12 = arith.constant dense<0xFF800000> : vector<8xf32>
    %22 = vector.multi_reduction <maximumf>, %21, %cst_12 [1] : vector<8x8xf32> to vector<8xf32>
    %23 = vector.shape_cast %22 : vector<8xf32> to vector<8x1xf32>
    %24 = vector.broadcast %23 : vector<8x1xf32> to vector<8x8xf32>
    %25 = arith.subf %21, %24 : vector<8x8xf32>
    %26 = math.exp %25 : vector<8x8xf32>
    %cst_13 = arith.constant dense<0.000000e+00> : vector<8xf32>
    %27 = vector.multi_reduction <add>, %26, %cst_13 [1] : vector<8x8xf32> to vector<8xf32>
    %28 = vector.shape_cast %27 : vector<8xf32> to vector<8x1xf32>
    %29 = arith.truncf %26 : vector<8x8xf32> to vector<8x8xbf16>
    %cst_14 = arith.constant dense<0.000000e+00> : vector<8x8xf32>
    %30 = tpu.matmul %29, %20, %cst_14 {dimension_numbers = #tpu.dot_dimension_numbers<[1], [0], [0], [1], [0, 0, 1, 1], [], []>} : vector<8x8xbf16>, vector<8x8xbf16>, vector<8x8xf32> -> vector<8x8xf32>
    %31 = tpu.reciprocal %28 {approx = true} : vector<8x1xf32> -> vector<8x1xf32>
    %32 = vector.broadcast %31 : vector<8x1xf32> to vector<8x8xf32>
    %33 = arith.mulf %30, %32 : vector<8x8xf32>
    %34 = vector.extract_strided_slice %16 {offsets = [0, 8], sizes = [8, 8], strides = [1, 1]} : vector<8x32xbf16> to vector<8x8xbf16>
    %35 = vector.extract_strided_slice %17 {offsets = [0, 8], sizes = [8, 8], strides = [1, 1]} : vector<8x64xbf16> to vector<8x8xbf16>
    %36 = vector.extract_strided_slice %17 {offsets = [0, 40], sizes = [8, 8], strides = [1, 1]} : vector<8x64xbf16> to vector<8x8xbf16>
    %cst_15 = arith.constant dense<0.000000e+00> : vector<8x8xf32>
    %37 = tpu.matmul %34, %35, %cst_15 {dimension_numbers = #tpu.dot_dimension_numbers<[1], [1], [0], [0], [0, 0, 1, 0], [], []>} : vector<8x8xbf16>, vector<8x8xbf16>, vector<8x8xf32> -> vector<8x8xf32>
    %cst_16 = arith.constant dense<0xFF800000> : vector<8xf32>
    %38 = vector.multi_reduction <maximumf>, %37, %cst_16 [1] : vector<8x8xf32> to vector<8xf32>
    %39 = vector.shape_cast %38 : vector<8xf32> to vector<8x1xf32>
    %40 = vector.broadcast %39 : vector<8x1xf32> to vector<8x8xf32>
    %41 = arith.subf %37, %40 : vector<8x8xf32>
    %42 = math.exp %41 : vector<8x8xf32>
    %cst_17 = arith.constant dense<0.000000e+00> : vector<8xf32>
    %43 = vector.multi_reduction <add>, %42, %cst_17 [1] : vector<8x8xf32> to vector<8xf32>
    %44 = vector.shape_cast %43 : vector<8xf32> to vector<8x1xf32>
    %45 = arith.truncf %42 : vector<8x8xf32> to vector<8x8xbf16>
    %cst_18 = arith.constant dense<0.000000e+00> : vector<8x8xf32>
    %46 = tpu.matmul %45, %36, %cst_18 {dimension_numbers = #tpu.dot_dimension_numbers<[1], [0], [0], [1], [0, 0, 1, 1], [], []>} : vector<8x8xbf16>, vector<8x8xbf16>, vector<8x8xf32> -> vector<8x8xf32>
    %47 = tpu.reciprocal %44 {approx = true} : vector<8x1xf32> -> vector<8x1xf32>
    %48 = vector.broadcast %47 : vector<8x1xf32> to vector<8x8xf32>
    %49 = arith.mulf %46, %48 : vector<8x8xf32>
    %50 = vector.extract_strided_slice %16 {offsets = [0, 16], sizes = [8, 8], strides = [1, 1]} : vector<8x32xbf16> to vector<8x8xbf16>
    %51 = vector.extract_strided_slice %17 {offsets = [0, 16], sizes = [8, 8], strides = [1, 1]} : vector<8x64xbf16> to vector<8x8xbf16>
    %52 = vector.extract_strided_slice %17 {offsets = [0, 48], sizes = [8, 8], strides = [1, 1]} : vector<8x64xbf16> to vector<8x8xbf16>
    %cst_19 = arith.constant dense<0.000000e+00> : vector<8x8xf32>
    %53 = tpu.matmul %50, %51, %cst_19 {dimension_numbers = #tpu.dot_dimension_numbers<[1], [1], [0], [0], [0, 0, 1, 0], [], []>} : vector<8x8xbf16>, vector<8x8xbf16>, vector<8x8xf32> -> vector<8x8xf32>
    %cst_20 = arith.constant dense<0xFF800000> : vector<8xf32>
    %54 = vector.multi_reduction <maximumf>, %53, %cst_20 [1] : vector<8x8xf32> to vector<8xf32>
    %55 = vector.shape_cast %54 : vector<8xf32> to vector<8x1xf32>
    %56 = vector.broadcast %55 : vector<8x1xf32> to vector<8x8xf32>
    %57 = arith.subf %53, %56 : vector<8x8xf32>
    %58 = math.exp %57 : vector<8x8xf32>
    %cst_21 = arith.constant dense<0.000000e+00> : vector<8xf32>
    %59 = vector.multi_reduction <add>, %58, %cst_21 [1] : vector<8x8xf32> to vector<8xf32>
    %60 = vector.shape_cast %59 : vector<8xf32> to vector<8x1xf32>
    %61 = arith.truncf %58 : vector<8x8xf32> to vector<8x8xbf16>
    %cst_22 = arith.constant dense<0.000000e+00> : vector<8x8xf32>
    %62 = tpu.matmul %61, %52, %cst_22 {dimension_numbers = #tpu.dot_dimension_numbers<[1], [0], [0], [1], [0, 0, 1, 1], [], []>} : vector<8x8xbf16>, vector<8x8xbf16>, vector<8x8xf32> -> vector<8x8xf32>
    %63 = tpu.reciprocal %60 {approx = true} : vector<8x1xf32> -> vector<8x1xf32>
    %64 = vector.broadcast %63 : vector<8x1xf32> to vector<8x8xf32>
    %65 = arith.mulf %62, %64 : vector<8x8xf32>
    %66 = vector.extract_strided_slice %16 {offsets = [0, 24], sizes = [8, 8], strides = [1, 1]} : vector<8x32xbf16> to vector<8x8xbf16>
    %67 = vector.extract_strided_slice %17 {offsets = [0, 24], sizes = [8, 8], strides = [1, 1]} : vector<8x64xbf16> to vector<8x8xbf16>
    %68 = vector.extract_strided_slice %17 {offsets = [0, 56], sizes = [8, 8], strides = [1, 1]} : vector<8x64xbf16> to vector<8x8xbf16>
    %cst_23 = arith.constant dense<0.000000e+00> : vector<8x8xf32>
    %69 = tpu.matmul %66, %67, %cst_23 {dimension_numbers = #tpu.dot_dimension_numbers<[1], [1], [0], [0], [0, 0, 1, 0], [], []>} : vector<8x8xbf16>, vector<8x8xbf16>, vector<8x8xf32> -> vector<8x8xf32>
    %cst_24 = arith.constant dense<0xFF800000> : vector<8xf32>
    %70 = vector.multi_reduction <maximumf>, %69, %cst_24 [1] : vector<8x8xf32> to vector<8xf32>
    %71 = vector.shape_cast %70 : vector<8xf32> to vector<8x1xf32>
    %72 = vector.broadcast %71 : vector<8x1xf32> to vector<8x8xf32>
    %73 = arith.subf %69, %72 : vector<8x8xf32>
    %74 = math.exp %73 : vector<8x8xf32>
    %cst_25 = arith.constant dense<0.000000e+00> : vector<8xf32>
    %75 = vector.multi_reduction <add>, %74, %cst_25 [1] : vector<8x8xf32> to vector<8xf32>
    %76 = vector.shape_cast %75 : vector<8xf32> to vector<8x1xf32>
    %77 = arith.truncf %74 : vector<8x8xf32> to vector<8x8xbf16>
    %cst_26 = arith.constant dense<0.000000e+00> : vector<8x8xf32>
    %78 = tpu.matmul %77, %68, %cst_26 {dimension_numbers = #tpu.dot_dimension_numbers<[1], [0], [0], [1], [0, 0, 1, 1], [], []>} : vector<8x8xbf16>, vector<8x8xbf16>, vector<8x8xf32> -> vector<8x8xf32>
    %79 = tpu.reciprocal %76 {approx = true} : vector<8x1xf32> -> vector<8x1xf32>
    %80 = vector.broadcast %79 : vector<8x1xf32> to vector<8x8xf32>
    %81 = arith.mulf %78, %80 : vector<8x8xf32>
    %82 = tpu.concatenate %33, %49, %65, %81 in 1 : vector<8x8xf32>, vector<8x8xf32>, vector<8x8xf32>, vector<8x8xf32> -> vector<8x32xf32>
    %83 = arith.truncf %82 : vector<8x32xf32> to vector<8x32xbf16>
    %c0_27 = arith.constant 0 : index
    %c0_28 = arith.constant 0 : index
    %c0_29 = arith.constant 0 : index
    %84 = vector.load %arg6[%c0_27, %c0_28, %c0_29] : memref<1x32x32xbf16, #tpu.memory_space<vmem>>, vector<1x32x32xbf16>
    %85 = vector.shape_cast %84 : vector<1x32x32xbf16> to vector<32x32xbf16>
    %cst_30 = arith.constant dense<0.000000e+00> : vector<8x32xf32>
    %86 = tpu.matmul %83, %85, %cst_30 {dimension_numbers = #tpu.dot_dimension_numbers<[1], [0], [0], [1], [0, 0, 1, 1], [], []>} : vector<8x32xbf16>, vector<32x32xbf16>, vector<8x32xf32> -> vector<8x32xf32>
    %c0_31 = arith.constant 0 : index
    %c0_32 = arith.constant 0 : index
    %c0_33 = arith.constant 0 : index
    %87 = vector.load %arg7[%c0_31, %c0_32, %c0_33] : memref<1x1x32xf32, #tpu.memory_space<vmem>>, vector<1x1x32xf32>
    %88 = vector.shape_cast %87 : vector<1x1x32xf32> to vector<1x32xf32>
    %89 = vector.broadcast %88 : vector<1x32xf32> to vector<8x32xf32>
    %90 = arith.addf %86, %89 : vector<8x32xf32>
    %c0_34 = arith.constant 0 : index
    %c0_35 = arith.constant 0 : index
    %c0_36 = arith.constant 0 : index
    %91 = vector.load %arg18[%c0_34, %c0_35, %c0_36] : memref<1x1x32xf32, #tpu.memory_space<vmem>>, vector<1x1x32xf32>
    %92 = vector.shape_cast %91 : vector<1x1x32xf32> to vector<1x32xf32>
    %c0_37 = arith.constant 0 : index
    %c0_38 = arith.constant 0 : index
    %c0_39 = arith.constant 0 : index
    %93 = vector.load %arg19[%c0_37, %c0_38, %c0_39] : memref<1x1x32xf32, #tpu.memory_space<vmem>>, vector<1x1x32xf32>
    %94 = vector.shape_cast %93 : vector<1x1x32xf32> to vector<1x32xf32>
    %95 = arith.addf %4, %90 : vector<8x32xf32>
    %cst_40 = arith.constant dense<0.000000e+00> : vector<8xf32>
    %96 = vector.multi_reduction <add>, %95, %cst_40 [1] : vector<8x32xf32> to vector<8xf32>
    %97 = vector.shape_cast %96 : vector<8xf32> to vector<8x1xf32>
    %cst_41 = arith.constant 3.200000e+01 : f32
    %98 = vector.broadcast %cst_41 : f32 to vector<8x1xf32>
    %99 = arith.divf %97, %98 : vector<8x1xf32>
    %100 = vector.broadcast %99 : vector<8x1xf32> to vector<8x32xf32>
    %101 = arith.subf %95, %100 : vector<8x32xf32>
    %102 = arith.mulf %101, %101 : vector<8x32xf32>
    %cst_42 = arith.constant dense<0.000000e+00> : vector<8xf32>
    %103 = vector.multi_reduction <add>, %102, %cst_42 [1] : vector<8x32xf32> to vector<8xf32>
    %104 = vector.shape_cast %103 : vector<8xf32> to vector<8x1xf32>
    %cst_43 = arith.constant 3.200000e+01 : f32
    %105 = vector.broadcast %cst_43 : f32 to vector<8x1xf32>
    %106 = arith.divf %104, %105 : vector<8x1xf32>
    %cst_44 = arith.constant 9.99999974E-6 : f32
    %107 = vector.broadcast %cst_44 : f32 to vector<8x1xf32>
    %108 = arith.addf %106, %107 : vector<8x1xf32>
    %109 = math.rsqrt %108 : vector<8x1xf32>
    %110 = vector.broadcast %109 : vector<8x1xf32> to vector<8x32xf32>
    %111 = arith.mulf %101, %110 : vector<8x32xf32>
    %112 = vector.broadcast %92 : vector<1x32xf32> to vector<8x32xf32>
    %113 = arith.mulf %111, %112 : vector<8x32xf32>
    %114 = vector.broadcast %94 : vector<1x32xf32> to vector<8x32xf32>
    %115 = arith.addf %113, %114 : vector<8x32xf32>
    %116 = arith.truncf %115 : vector<8x32xf32> to vector<8x32xbf16>
    %c0_45 = arith.constant 0 : index
    %c0_46 = arith.constant 0 : index
    %c0_47 = arith.constant 0 : index
    %117 = vector.load %arg8[%c0_45, %c0_46, %c0_47] : memref<1x32x32xbf16, #tpu.memory_space<vmem>>, vector<1x32x32xbf16>
    %118 = vector.shape_cast %117 : vector<1x32x32xbf16> to vector<32x32xbf16>
    %cst_48 = arith.constant dense<0.000000e+00> : vector<8x32xf32>
    %119 = tpu.matmul %116, %118, %cst_48 {dimension_numbers = #tpu.dot_dimension_numbers<[1], [0], [0], [1], [0, 0, 1, 1], [], []>} : vector<8x32xbf16>, vector<32x32xbf16>, vector<8x32xf32> -> vector<8x32xf32>
    %c0_49 = arith.constant 0 : index
    %c0_50 = arith.constant 0 : index
    %c0_51 = arith.constant 0 : index
    %120 = vector.load %arg9[%c0_49, %c0_50, %c0_51] : memref<1x1x32xf32, #tpu.memory_space<vmem>>, vector<1x1x32xf32>
    %121 = vector.shape_cast %120 : vector<1x1x32xf32> to vector<1x32xf32>
    %122 = vector.broadcast %121 : vector<1x32xf32> to vector<8x32xf32>
    %123 = arith.addf %119, %122 : vector<8x32xf32>
    %124 = arith.truncf %123 : vector<8x32xf32> to vector<8x32xbf16>
    %c0_52 = arith.constant 0 : index
    %c0_53 = arith.constant 0 : index
    %c0_54 = arith.constant 0 : index
    %125 = vector.load %arg10[%c0_52, %c0_53, %c0_54] : memref<1x32x64xbf16, #tpu.memory_space<vmem>>, vector<1x32x64xbf16>
    %126 = vector.shape_cast %125 : vector<1x32x64xbf16> to vector<32x64xbf16>
    %cst_55 = arith.constant dense<0.000000e+00> : vector<8x64xf32>
    %127 = tpu.matmul %7, %126, %cst_55 {dimension_numbers = #tpu.dot_dimension_numbers<[1], [0], [0], [1], [0, 0, 1, 1], [], []>} : vector<8x32xbf16>, vector<32x64xbf16>, vector<8x64xf32> -> vector<8x64xf32>
    %c0_56 = arith.constant 0 : index
    %c0_57 = arith.constant 0 : index
    %c0_58 = arith.constant 0 : index
    %128 = vector.load %arg11[%c0_56, %c0_57, %c0_58] : memref<1x1x64xf32, #tpu.memory_space<vmem>>, vector<1x1x64xf32>
    %129 = vector.shape_cast %128 : vector<1x1x64xf32> to vector<1x64xf32>
    %130 = vector.broadcast %129 : vector<1x64xf32> to vector<8x64xf32>
    %131 = arith.addf %127, %130 : vector<8x64xf32>
    %132 = arith.truncf %131 : vector<8x64xf32> to vector<8x64xbf16>
    %133 = vector.extract_strided_slice %124 {offsets = [0, 0], sizes = [8, 8], strides = [1, 1]} : vector<8x32xbf16> to vector<8x8xbf16>
    %134 = vector.extract_strided_slice %132 {offsets = [0, 0], sizes = [8, 8], strides = [1, 1]} : vector<8x64xbf16> to vector<8x8xbf16>
    %135 = vector.extract_strided_slice %132 {offsets = [0, 32], sizes = [8, 8], strides = [1, 1]} : vector<8x64xbf16> to vector<8x8xbf16>
    %cst_59 = arith.constant dense<0.000000e+00> : vector<8x8xf32>
    %136 = tpu.matmul %133, %134, %cst_59 {dimension_numbers = #tpu.dot_dimension_numbers<[1], [1], [0], [0], [0, 0, 1, 0], [], []>} : vector<8x8xbf16>, vector<8x8xbf16>, vector<8x8xf32> -> vector<8x8xf32>
    %cst_60 = arith.constant dense<0xFF800000> : vector<8xf32>
    %137 = vector.multi_reduction <maximumf>, %136, %cst_60 [1] : vector<8x8xf32> to vector<8xf32>
    %138 = vector.shape_cast %137 : vector<8xf32> to vector<8x1xf32>
    %139 = vector.broadcast %138 : vector<8x1xf32> to vector<8x8xf32>
    %140 = arith.subf %136, %139 : vector<8x8xf32>
    %141 = math.exp %140 : vector<8x8xf32>
    %cst_61 = arith.constant dense<0.000000e+00> : vector<8xf32>
    %142 = vector.multi_reduction <add>, %141, %cst_61 [1] : vector<8x8xf32> to vector<8xf32>
    %143 = vector.shape_cast %142 : vector<8xf32> to vector<8x1xf32>
    %144 = arith.truncf %141 : vector<8x8xf32> to vector<8x8xbf16>
    %cst_62 = arith.constant dense<0.000000e+00> : vector<8x8xf32>
    %145 = tpu.matmul %144, %135, %cst_62 {dimension_numbers = #tpu.dot_dimension_numbers<[1], [0], [0], [1], [0, 0, 1, 1], [], []>} : vector<8x8xbf16>, vector<8x8xbf16>, vector<8x8xf32> -> vector<8x8xf32>
    %146 = tpu.reciprocal %143 {approx = true} : vector<8x1xf32> -> vector<8x1xf32>
    %147 = vector.broadcast %146 : vector<8x1xf32> to vector<8x8xf32>
    %148 = arith.mulf %145, %147 : vector<8x8xf32>
    %149 = vector.extract_strided_slice %124 {offsets = [0, 8], sizes = [8, 8], strides = [1, 1]} : vector<8x32xbf16> to vector<8x8xbf16>
    %150 = vector.extract_strided_slice %132 {offsets = [0, 8], sizes = [8, 8], strides = [1, 1]} : vector<8x64xbf16> to vector<8x8xbf16>
    %151 = vector.extract_strided_slice %132 {offsets = [0, 40], sizes = [8, 8], strides = [1, 1]} : vector<8x64xbf16> to vector<8x8xbf16>
    %cst_63 = arith.constant dense<0.000000e+00> : vector<8x8xf32>
    %152 = tpu.matmul %149, %150, %cst_63 {dimension_numbers = #tpu.dot_dimension_numbers<[1], [1], [0], [0], [0, 0, 1, 0], [], []>} : vector<8x8xbf16>, vector<8x8xbf16>, vector<8x8xf32> -> vector<8x8xf32>
    %cst_64 = arith.constant dense<0xFF800000> : vector<8xf32>
    %153 = vector.multi_reduction <maximumf>, %152, %cst_64 [1] : vector<8x8xf32> to vector<8xf32>
    %154 = vector.shape_cast %153 : vector<8xf32> to vector<8x1xf32>
    %155 = vector.broadcast %154 : vector<8x1xf32> to vector<8x8xf32>
    %156 = arith.subf %152, %155 : vector<8x8xf32>
    %157 = math.exp %156 : vector<8x8xf32>
    %cst_65 = arith.constant dense<0.000000e+00> : vector<8xf32>
    %158 = vector.multi_reduction <add>, %157, %cst_65 [1] : vector<8x8xf32> to vector<8xf32>
    %159 = vector.shape_cast %158 : vector<8xf32> to vector<8x1xf32>
    %160 = arith.truncf %157 : vector<8x8xf32> to vector<8x8xbf16>
    %cst_66 = arith.constant dense<0.000000e+00> : vector<8x8xf32>
    %161 = tpu.matmul %160, %151, %cst_66 {dimension_numbers = #tpu.dot_dimension_numbers<[1], [0], [0], [1], [0, 0, 1, 1], [], []>} : vector<8x8xbf16>, vector<8x8xbf16>, vector<8x8xf32> -> vector<8x8xf32>
    %162 = tpu.reciprocal %159 {approx = true} : vector<8x1xf32> -> vector<8x1xf32>
    %163 = vector.broadcast %162 : vector<8x1xf32> to vector<8x8xf32>
    %164 = arith.mulf %161, %163 : vector<8x8xf32>
    %165 = vector.extract_strided_slice %124 {offsets = [0, 16], sizes = [8, 8], strides = [1, 1]} : vector<8x32xbf16> to vector<8x8xbf16>
    %166 = vector.extract_strided_slice %132 {offsets = [0, 16], sizes = [8, 8], strides = [1, 1]} : vector<8x64xbf16> to vector<8x8xbf16>
    %167 = vector.extract_strided_slice %132 {offsets = [0, 48], sizes = [8, 8], strides = [1, 1]} : vector<8x64xbf16> to vector<8x8xbf16>
    %cst_67 = arith.constant dense<0.000000e+00> : vector<8x8xf32>
    %168 = tpu.matmul %165, %166, %cst_67 {dimension_numbers = #tpu.dot_dimension_numbers<[1], [1], [0], [0], [0, 0, 1, 0], [], []>} : vector<8x8xbf16>, vector<8x8xbf16>, vector<8x8xf32> -> vector<8x8xf32>
    %cst_68 = arith.constant dense<0xFF800000> : vector<8xf32>
    %169 = vector.multi_reduction <maximumf>, %168, %cst_68 [1] : vector<8x8xf32> to vector<8xf32>
    %170 = vector.shape_cast %169 : vector<8xf32> to vector<8x1xf32>
    %171 = vector.broadcast %170 : vector<8x1xf32> to vector<8x8xf32>
    %172 = arith.subf %168, %171 : vector<8x8xf32>
    %173 = math.exp %172 : vector<8x8xf32>
    %cst_69 = arith.constant dense<0.000000e+00> : vector<8xf32>
    %174 = vector.multi_reduction <add>, %173, %cst_69 [1] : vector<8x8xf32> to vector<8xf32>
    %175 = vector.shape_cast %174 : vector<8xf32> to vector<8x1xf32>
    %176 = arith.truncf %173 : vector<8x8xf32> to vector<8x8xbf16>
    %cst_70 = arith.constant dense<0.000000e+00> : vector<8x8xf32>
    %177 = tpu.matmul %176, %167, %cst_70 {dimension_numbers = #tpu.dot_dimension_numbers<[1], [0], [0], [1], [0, 0, 1, 1], [], []>} : vector<8x8xbf16>, vector<8x8xbf16>, vector<8x8xf32> -> vector<8x8xf32>
    %178 = tpu.reciprocal %175 {approx = true} : vector<8x1xf32> -> vector<8x1xf32>
    %179 = vector.broadcast %178 : vector<8x1xf32> to vector<8x8xf32>
    %180 = arith.mulf %177, %179 : vector<8x8xf32>
    %181 = vector.extract_strided_slice %124 {offsets = [0, 24], sizes = [8, 8], strides = [1, 1]} : vector<8x32xbf16> to vector<8x8xbf16>
    %182 = vector.extract_strided_slice %132 {offsets = [0, 24], sizes = [8, 8], strides = [1, 1]} : vector<8x64xbf16> to vector<8x8xbf16>
    %183 = vector.extract_strided_slice %132 {offsets = [0, 56], sizes = [8, 8], strides = [1, 1]} : vector<8x64xbf16> to vector<8x8xbf16>
    %cst_71 = arith.constant dense<0.000000e+00> : vector<8x8xf32>
    %184 = tpu.matmul %181, %182, %cst_71 {dimension_numbers = #tpu.dot_dimension_numbers<[1], [1], [0], [0], [0, 0, 1, 0], [], []>} : vector<8x8xbf16>, vector<8x8xbf16>, vector<8x8xf32> -> vector<8x8xf32>
    %cst_72 = arith.constant dense<0xFF800000> : vector<8xf32>
    %185 = vector.multi_reduction <maximumf>, %184, %cst_72 [1] : vector<8x8xf32> to vector<8xf32>
    %186 = vector.shape_cast %185 : vector<8xf32> to vector<8x1xf32>
    %187 = vector.broadcast %186 : vector<8x1xf32> to vector<8x8xf32>
    %188 = arith.subf %184, %187 : vector<8x8xf32>
    %189 = math.exp %188 : vector<8x8xf32>
    %cst_73 = arith.constant dense<0.000000e+00> : vector<8xf32>
    %190 = vector.multi_reduction <add>, %189, %cst_73 [1] : vector<8x8xf32> to vector<8xf32>
    %191 = vector.shape_cast %190 : vector<8xf32> to vector<8x1xf32>
    %192 = arith.truncf %189 : vector<8x8xf32> to vector<8x8xbf16>
    %cst_74 = arith.constant dense<0.000000e+00> : vector<8x8xf32>
    %193 = tpu.matmul %192, %183, %cst_74 {dimension_numbers = #tpu.dot_dimension_numbers<[1], [0], [0], [1], [0, 0, 1, 1], [], []>} : vector<8x8xbf16>, vector<8x8xbf16>, vector<8x8xf32> -> vector<8x8xf32>
    %194 = tpu.reciprocal %191 {approx = true} : vector<8x1xf32> -> vector<8x1xf32>
    %195 = vector.broadcast %194 : vector<8x1xf32> to vector<8x8xf32>
    %196 = arith.mulf %193, %195 : vector<8x8xf32>
    %197 = tpu.concatenate %148, %164, %180, %196 in 1 : vector<8x8xf32>, vector<8x8xf32>, vector<8x8xf32>, vector<8x8xf32> -> vector<8x32xf32>
    %198 = arith.truncf %197 : vector<8x32xf32> to vector<8x32xbf16>
    %c0_75 = arith.constant 0 : index
    %c0_76 = arith.constant 0 : index
    %c0_77 = arith.constant 0 : index
    %199 = vector.load %arg12[%c0_75, %c0_76, %c0_77] : memref<1x32x32xbf16, #tpu.memory_space<vmem>>, vector<1x32x32xbf16>
    %200 = vector.shape_cast %199 : vector<1x32x32xbf16> to vector<32x32xbf16>
    %cst_78 = arith.constant dense<0.000000e+00> : vector<8x32xf32>
    %201 = tpu.matmul %198, %200, %cst_78 {dimension_numbers = #tpu.dot_dimension_numbers<[1], [0], [0], [1], [0, 0, 1, 1], [], []>} : vector<8x32xbf16>, vector<32x32xbf16>, vector<8x32xf32> -> vector<8x32xf32>
    %c0_79 = arith.constant 0 : index
    %c0_80 = arith.constant 0 : index
    %c0_81 = arith.constant 0 : index
    %202 = vector.load %arg13[%c0_79, %c0_80, %c0_81] : memref<1x1x32xf32, #tpu.memory_space<vmem>>, vector<1x1x32xf32>
    %203 = vector.shape_cast %202 : vector<1x1x32xf32> to vector<1x32xf32>
    %204 = vector.broadcast %203 : vector<1x32xf32> to vector<8x32xf32>
    %205 = arith.addf %201, %204 : vector<8x32xf32>
    %c0_82 = arith.constant 0 : index
    %c0_83 = arith.constant 0 : index
    %c0_84 = arith.constant 0 : index
    %206 = vector.load %arg20[%c0_82, %c0_83, %c0_84] : memref<1x1x32xf32, #tpu.memory_space<vmem>>, vector<1x1x32xf32>
    %207 = vector.shape_cast %206 : vector<1x1x32xf32> to vector<1x32xf32>
    %c0_85 = arith.constant 0 : index
    %c0_86 = arith.constant 0 : index
    %c0_87 = arith.constant 0 : index
    %208 = vector.load %arg21[%c0_85, %c0_86, %c0_87] : memref<1x1x32xf32, #tpu.memory_space<vmem>>, vector<1x1x32xf32>
    %209 = vector.shape_cast %208 : vector<1x1x32xf32> to vector<1x32xf32>
    %210 = arith.addf %115, %205 : vector<8x32xf32>
    %cst_88 = arith.constant dense<0.000000e+00> : vector<8xf32>
    %211 = vector.multi_reduction <add>, %210, %cst_88 [1] : vector<8x32xf32> to vector<8xf32>
    %212 = vector.shape_cast %211 : vector<8xf32> to vector<8x1xf32>
    %cst_89 = arith.constant 3.200000e+01 : f32
    %213 = vector.broadcast %cst_89 : f32 to vector<8x1xf32>
    %214 = arith.divf %212, %213 : vector<8x1xf32>
    %215 = vector.broadcast %214 : vector<8x1xf32> to vector<8x32xf32>
    %216 = arith.subf %210, %215 : vector<8x32xf32>
    %217 = arith.mulf %216, %216 : vector<8x32xf32>
    %cst_90 = arith.constant dense<0.000000e+00> : vector<8xf32>
    %218 = vector.multi_reduction <add>, %217, %cst_90 [1] : vector<8x32xf32> to vector<8xf32>
    %219 = vector.shape_cast %218 : vector<8xf32> to vector<8x1xf32>
    %cst_91 = arith.constant 3.200000e+01 : f32
    %220 = vector.broadcast %cst_91 : f32 to vector<8x1xf32>
    %221 = arith.divf %219, %220 : vector<8x1xf32>
    %cst_92 = arith.constant 9.99999974E-6 : f32
    %222 = vector.broadcast %cst_92 : f32 to vector<8x1xf32>
    %223 = arith.addf %221, %222 : vector<8x1xf32>
    %224 = math.rsqrt %223 : vector<8x1xf32>
    %225 = vector.broadcast %224 : vector<8x1xf32> to vector<8x32xf32>
    %226 = arith.mulf %216, %225 : vector<8x32xf32>
    %227 = vector.broadcast %207 : vector<1x32xf32> to vector<8x32xf32>
    %228 = arith.mulf %226, %227 : vector<8x32xf32>
    %229 = vector.broadcast %209 : vector<1x32xf32> to vector<8x32xf32>
    %230 = arith.addf %228, %229 : vector<8x32xf32>
    %231 = arith.truncf %230 : vector<8x32xf32> to vector<8x32xbf16>
    %c0_93 = arith.constant 0 : index
    %c0_94 = arith.constant 0 : index
    %c0_95 = arith.constant 0 : index
    %232 = vector.load %arg14[%c0_93, %c0_94, %c0_95] : memref<1x32x64xbf16, #tpu.memory_space<vmem>>, vector<1x32x64xbf16>
    %233 = vector.shape_cast %232 : vector<1x32x64xbf16> to vector<32x64xbf16>
    %cst_96 = arith.constant dense<0.000000e+00> : vector<8x64xf32>
    %234 = tpu.matmul %231, %233, %cst_96 {dimension_numbers = #tpu.dot_dimension_numbers<[1], [0], [0], [1], [0, 0, 1, 1], [], []>} : vector<8x32xbf16>, vector<32x64xbf16>, vector<8x64xf32> -> vector<8x64xf32>
    %c0_97 = arith.constant 0 : index
    %c0_98 = arith.constant 0 : index
    %c0_99 = arith.constant 0 : index
    %235 = vector.load %arg15[%c0_97, %c0_98, %c0_99] : memref<1x1x64xf32, #tpu.memory_space<vmem>>, vector<1x1x64xf32>
    %236 = vector.shape_cast %235 : vector<1x1x64xf32> to vector<1x64xf32>
    %237 = vector.broadcast %236 : vector<1x64xf32> to vector<8x64xf32>
    %238 = arith.addf %234, %237 : vector<8x64xf32>
    %cst_100 = arith.constant 0.000000e+00 : f32
    %239 = vector.broadcast %cst_100 : f32 to vector<8x64xf32>
    %240 = arith.maximumf %238, %239 : vector<8x64xf32>
    %241 = arith.truncf %240 : vector<8x64xf32> to vector<8x64xbf16>
    %c0_101 = arith.constant 0 : index
    %c0_102 = arith.constant 0 : index
    %c0_103 = arith.constant 0 : index
    %242 = vector.load %arg16[%c0_101, %c0_102, %c0_103] : memref<1x64x32xbf16, #tpu.memory_space<vmem>>, vector<1x64x32xbf16>
    %243 = vector.shape_cast %242 : vector<1x64x32xbf16> to vector<64x32xbf16>
    %cst_104 = arith.constant dense<0.000000e+00> : vector<8x32xf32>
    %244 = tpu.matmul %241, %243, %cst_104 {dimension_numbers = #tpu.dot_dimension_numbers<[1], [0], [0], [1], [0, 0, 1, 1], [], []>} : vector<8x64xbf16>, vector<64x32xbf16>, vector<8x32xf32> -> vector<8x32xf32>
    %c0_105 = arith.constant 0 : index
    %c0_106 = arith.constant 0 : index
    %c0_107 = arith.constant 0 : index
    %245 = vector.load %arg17[%c0_105, %c0_106, %c0_107] : memref<1x1x32xf32, #tpu.memory_space<vmem>>, vector<1x1x32xf32>
    %246 = vector.shape_cast %245 : vector<1x1x32xf32> to vector<1x32xf32>
    %247 = vector.broadcast %246 : vector<1x32xf32> to vector<8x32xf32>
    %248 = arith.addf %244, %247 : vector<8x32xf32>
    %c0_108 = arith.constant 0 : index
    %c0_109 = arith.constant 0 : index
    %c0_110 = arith.constant 0 : index
    %249 = vector.load %arg22[%c0_108, %c0_109, %c0_110] : memref<1x1x32xf32, #tpu.memory_space<vmem>>, vector<1x1x32xf32>
    %250 = vector.shape_cast %249 : vector<1x1x32xf32> to vector<1x32xf32>
    %c0_111 = arith.constant 0 : index
    %c0_112 = arith.constant 0 : index
    %c0_113 = arith.constant 0 : index
    %251 = vector.load %arg23[%c0_111, %c0_112, %c0_113] : memref<1x1x32xf32, #tpu.memory_space<vmem>>, vector<1x1x32xf32>
    %252 = vector.shape_cast %251 : vector<1x1x32xf32> to vector<1x32xf32>
    %253 = arith.addf %230, %248 : vector<8x32xf32>
    %cst_114 = arith.constant dense<0.000000e+00> : vector<8xf32>
    %254 = vector.multi_reduction <add>, %253, %cst_114 [1] : vector<8x32xf32> to vector<8xf32>
    %255 = vector.shape_cast %254 : vector<8xf32> to vector<8x1xf32>
    %cst_115 = arith.constant 3.200000e+01 : f32
    %256 = vector.broadcast %cst_115 : f32 to vector<8x1xf32>
    %257 = arith.divf %255, %256 : vector<8x1xf32>
    %258 = vector.broadcast %257 : vector<8x1xf32> to vector<8x32xf32>
    %259 = arith.subf %253, %258 : vector<8x32xf32>
    %260 = arith.mulf %259, %259 : vector<8x32xf32>
    %cst_116 = arith.constant dense<0.000000e+00> : vector<8xf32>
    %261 = vector.multi_reduction <add>, %260, %cst_116 [1] : vector<8x32xf32> to vector<8xf32>
    %262 = vector.shape_cast %261 : vector<8xf32> to vector<8x1xf32>
    %cst_117 = arith.constant 3.200000e+01 : f32
    %263 = vector.broadcast %cst_117 : f32 to vector<8x1xf32>
    %264 = arith.divf %262, %263 : vector<8x1xf32>
    %cst_118 = arith.constant 9.99999974E-6 : f32
    %265 = vector.broadcast %cst_118 : f32 to vector<8x1xf32>
    %266 = arith.addf %264, %265 : vector<8x1xf32>
    %267 = math.rsqrt %266 : vector<8x1xf32>
    %268 = vector.broadcast %267 : vector<8x1xf32> to vector<8x32xf32>
    %269 = arith.mulf %259, %268 : vector<8x32xf32>
    %270 = vector.broadcast %250 : vector<1x32xf32> to vector<8x32xf32>
    %271 = arith.mulf %269, %270 : vector<8x32xf32>
    %272 = vector.broadcast %252 : vector<1x32xf32> to vector<8x32xf32>
    %273 = arith.addf %271, %272 : vector<8x32xf32>
    %c0_119 = arith.constant 0 : index
    %c0_120 = arith.constant 0 : index
    %c0_121 = arith.constant 0 : index
    %274 = vector.load %arg26[%c0_119, %c0_120, %c0_121] : memref<1x8x32xf32, #tpu.memory_space<vmem>>, vector<1x8x32xf32>
    %275 = vector.shape_cast %274 : vector<1x8x32xf32> to vector<8x32xf32>
    %276 = vector.shape_cast %273 : vector<8x32xf32> to vector<1x8x32xf32>
    tpu.vector_store %arg26[%c0_119, %c0_120, %c0_121], %276 {strides = array<i32>} : memref<1x8x32xf32, #tpu.memory_space<vmem>>, vector<1x8x32xf32>,
    %277 = vector.extract_strided_slice %5 {offsets = [0, 0], sizes = [7, 32], strides = [1, 1]} : vector<8x32xf32> to vector<7x32xf32>
    %278 = vector.extract_strided_slice %273 {offsets = [1, 0], sizes = [7, 32], strides = [1, 1]} : vector<8x32xf32> to vector<7x32xf32>
    %279 = arith.addf %277, %278 : vector<7x32xf32>
    %c0_122 = arith.constant 0 : index
    %c0_123 = arith.constant 0 : index
    %280 = vector.load %arg27[%c0_122, %c0_123] : memref<8x32xf32, #tpu.memory_space<vmem>>, vector<7x32xf32>
    tpu.vector_store %arg27[%c0_122, %c0_123], %279 {strides = array<i32>} : memref<8x32xf32, #tpu.memory_space<vmem>>, vector<7x32xf32>,
    %c1_i32 = arith.constant 1 : i32
    %281 = arith.cmpi eq, %arg1, %c1_i32 : i32
    %282 = arith.extui %281 : i1 to i32
    %c0_i32_124 = arith.constant 0 : i32
    %283 = arith.cmpi ne, %282, %c0_i32_124 : i32
    scf.if %283 {
      %c0_125 = arith.constant 0 : index
      %c0_126 = arith.constant 0 : index
      %c0_127 = arith.constant 0 : index
      %284 = vector.load %arg26[%c0_125, %c0_126, %c0_127] : memref<1x8x32xf32, #tpu.memory_space<vmem>>, vector<1x8x32xf32>
      %285 = vector.shape_cast %284 : vector<1x8x32xf32> to vector<8x32xf32>
      %c0_128 = arith.constant 0 : index
      %c0_129 = arith.constant 0 : index
      %286 = vector.load %arg24[%c0_128, %c0_129] : memref<1x32xf32, #tpu.memory_space<vmem>>, vector<1x32xf32>
      %c0_130 = arith.constant 0 : index
      %c0_131 = arith.constant 0 : index
      %287 = vector.load %arg25[%c0_130, %c0_131] : memref<1x32xf32, #tpu.memory_space<vmem>>, vector<1x32xf32>
      %cst_132 = arith.constant dense<0.000000e+00> : vector<8xf32>
      %288 = vector.multi_reduction <add>, %285, %cst_132 [1] : vector<8x32xf32> to vector<8xf32>
      %289 = vector.shape_cast %288 : vector<8xf32> to vector<8x1xf32>
      %cst_133 = arith.constant 3.200000e+01 : f32
      %290 = vector.broadcast %cst_133 : f32 to vector<8x1xf32>
      %291 = arith.divf %289, %290 : vector<8x1xf32>
      %292 = vector.broadcast %291 : vector<8x1xf32> to vector<8x32xf32>
      %293 = arith.subf %285, %292 : vector<8x32xf32>
      %294 = arith.mulf %293, %293 : vector<8x32xf32>
      %cst_134 = arith.constant dense<0.000000e+00> : vector<8xf32>
      %295 = vector.multi_reduction <add>, %294, %cst_134 [1] : vector<8x32xf32> to vector<8xf32>
      %296 = vector.shape_cast %295 : vector<8xf32> to vector<8x1xf32>
      %cst_135 = arith.constant 3.200000e+01 : f32
      %297 = vector.broadcast %cst_135 : f32 to vector<8x1xf32>
      %298 = arith.divf %296, %297 : vector<8x1xf32>
      %cst_136 = arith.constant 9.99999974E-6 : f32
      %299 = vector.broadcast %cst_136 : f32 to vector<8x1xf32>
      %300 = arith.addf %298, %299 : vector<8x1xf32>
      %301 = math.rsqrt %300 : vector<8x1xf32>
      %302 = vector.broadcast %301 : vector<8x1xf32> to vector<8x32xf32>
      %303 = arith.mulf %293, %302 : vector<8x32xf32>
      %304 = vector.broadcast %286 : vector<1x32xf32> to vector<8x32xf32>
      %305 = arith.mulf %303, %304 : vector<8x32xf32>
      %306 = vector.broadcast %287 : vector<1x32xf32> to vector<8x32xf32>
      %307 = arith.addf %305, %306 : vector<8x32xf32>
      %c0_137 = arith.constant 0 : index
      %c0_138 = arith.constant 0 : index
      %c0_139 = arith.constant 0 : index
      %308 = vector.load %arg26[%c0_137, %c0_138, %c0_139] : memref<1x8x32xf32, #tpu.memory_space<vmem>>, vector<1x8x32xf32>
      %309 = vector.shape_cast %308 : vector<1x8x32xf32> to vector<8x32xf32>
      %310 = vector.shape_cast %307 : vector<8x32xf32> to vector<1x8x32xf32>
      tpu.vector_store %arg26[%c0_137, %c0_138, %c0_139], %310 {strides = array<i32>} : memref<1x8x32xf32, #tpu.memory_space<vmem>>, vector<1x8x32xf32>,
    } else {
    }
    return
  }
  func.func @transform_0(%arg0: i32, %arg1: i32) -> (i32, i32, i32) {
    %c0_i32 = arith.constant 0 : i32
    %c0_i32_0 = arith.constant 0 : i32
    %c0_i32_1 = arith.constant 0 : i32
    return %arg0, %c0_i32, %c0_i32_0 : i32, i32, i32
  }
  func.func @transform_1(%arg0: i32, %arg1: i32) -> (i32, i32, i32) {
    %c0_i32 = arith.constant 0 : i32
    %c0_i32_0 = arith.constant 0 : i32
    %c0_i32_1 = arith.constant 0 : i32
    return %arg0, %c0_i32, %c0_i32_0 : i32, i32, i32
  }
  func.func @transform_2(%arg0: i32, %arg1: i32) -> (i32, i32, i32) {
    %c0_i32 = arith.constant 0 : i32
    %c0_i32_0 = arith.constant 0 : i32
    %c0_i32_1 = arith.constant 0 : i32
    return %arg1, %c0_i32, %c0_i32_0 : i32, i32, i32
  }
  func.func @transform_3(%arg0: i32, %arg1: i32) -> (i32, i32, i32) {
    %c0_i32 = arith.constant 0 : i32
    %c0_i32_0 = arith.constant 0 : i32
    %c0_i32_1 = arith.constant 0 : i32
    return %arg1, %c0_i32, %c0_i32_0 : i32, i32, i32
  }
  func.func @transform_4(%arg0: i32, %arg1: i32) -> (i32, i32, i32) {
    %c0_i32 = arith.constant 0 : i32
    %c0_i32_0 = arith.constant 0 : i32
    %c0_i32_1 = arith.constant 0 : i32
    return %arg1, %c0_i32, %c0_i32_0 : i32, i32, i32
  }
  func.func @transform_5(%arg0: i32, %arg1: i32) -> (i32, i32, i32) {
    %c0_i32 = arith.constant 0 : i32
    %c0_i32_0 = arith.constant 0 : i32
    %c0_i32_1 = arith.constant 0 : i32
    return %arg1, %c0_i32, %c0_i32_0 : i32, i32, i32
  }
  func.func @transform_6(%arg0: i32, %arg1: i32) -> (i32, i32, i32) {
    %c0_i32 = arith.constant 0 : i32
    %c0_i32_0 = arith.constant 0 : i32
    %c0_i32_1 = arith.constant 0 : i32
    return %arg1, %c0_i32, %c0_i32_0 : i32, i32, i32
  }
  func.func @transform_7(%arg0: i32, %arg1: i32) -> (i32, i32, i32) {
    %c0_i32 = arith.constant 0 : i32
    %c0_i32_0 = arith.constant 0 : i32
    %c0_i32_1 = arith.constant 0 : i32
    return %arg1, %c0_i32, %c0_i32_0 : i32, i32, i32
  }
  func.func @transform_8(%arg0: i32, %arg1: i32) -> (i32, i32, i32) {
    %c0_i32 = arith.constant 0 : i32
    %c0_i32_0 = arith.constant 0 : i32
    %c0_i32_1 = arith.constant 0 : i32
    return %arg1, %c0_i32, %c0_i32_0 : i32, i32, i32
  }
  func.func @transform_9(%arg0: i32, %arg1: i32) -> (i32, i32, i32) {
    %c0_i32 = arith.constant 0 : i32
    %c0_i32_0 = arith.constant 0 : i32
    %c0_i32_1 = arith.constant 0 : i32
    return %arg1, %c0_i32, %c0_i32_0 : i32, i32, i32
  }
  func.func @transform_10(%arg0: i32, %arg1: i32) -> (i32, i32, i32) {
    %c0_i32 = arith.constant 0 : i32
    %c0_i32_0 = arith.constant 0 : i32
    %c0_i32_1 = arith.constant 0 : i32
    return %arg1, %c0_i32, %c0_i32_0 : i32, i32, i32
  }
  func.func @transform_11(%arg0: i32, %arg1: i32) -> (i32, i32, i32) {
    %c0_i32 = arith.constant 0 : i32
    %c0_i32_0 = arith.constant 0 : i32
    %c0_i32_1 = arith.constant 0 : i32
    return %arg1, %c0_i32, %c0_i32_0 : i32, i32, i32
  }
  func.func @transform_12(%arg0: i32, %arg1: i32) -> (i32, i32, i32) {
    %c0_i32 = arith.constant 0 : i32
    %c0_i32_0 = arith.constant 0 : i32
    %c0_i32_1 = arith.constant 0 : i32
    return %arg1, %c0_i32, %c0_i32_0 : i32, i32, i32
  }
  func.func @transform_13(%arg0: i32, %arg1: i32) -> (i32, i32, i32) {
    %c0_i32 = arith.constant 0 : i32
    %c0_i32_0 = arith.constant 0 : i32
    %c0_i32_1 = arith.constant 0 : i32
    return %arg1, %c0_i32, %c0_i32_0 : i32, i32, i32
  }
  func.func @transform_14(%arg0: i32, %arg1: i32) -> (i32, i32, i32) {
    %c0_i32 = arith.constant 0 : i32
    %c0_i32_0 = arith.constant 0 : i32
    %c0_i32_1 = arith.constant 0 : i32
    return %arg1, %c0_i32, %c0_i32_0 : i32, i32, i32
  }
  func.func @transform_15(%arg0: i32, %arg1: i32) -> (i32, i32, i32) {
    %c0_i32 = arith.constant 0 : i32
    %c0_i32_0 = arith.constant 0 : i32
    %c0_i32_1 = arith.constant 0 : i32
    return %arg1, %c0_i32, %c0_i32_0 : i32, i32, i32
  }
  func.func @transform_16(%arg0: i32, %arg1: i32) -> (i32, i32, i32) {
    %c0_i32 = arith.constant 0 : i32
    %c0_i32_0 = arith.constant 0 : i32
    %c0_i32_1 = arith.constant 0 : i32
    return %arg1, %c0_i32, %c0_i32_0 : i32, i32, i32
  }
  func.func @transform_17(%arg0: i32, %arg1: i32) -> (i32, i32, i32) {
    %c0_i32 = arith.constant 0 : i32
    %c0_i32_0 = arith.constant 0 : i32
    %c0_i32_1 = arith.constant 0 : i32
    return %arg1, %c0_i32, %c0_i32_0 : i32, i32, i32
  }
  func.func @transform_18(%arg0: i32, %arg1: i32) -> (i32, i32, i32) {
    %c0_i32 = arith.constant 0 : i32
    %c0_i32_0 = arith.constant 0 : i32
    %c0_i32_1 = arith.constant 0 : i32
    return %arg1, %c0_i32, %c0_i32_0 : i32, i32, i32
  }
  func.func @transform_19(%arg0: i32, %arg1: i32) -> (i32, i32, i32) {
    %c0_i32 = arith.constant 0 : i32
    %c0_i32_0 = arith.constant 0 : i32
    %c0_i32_1 = arith.constant 0 : i32
    return %arg1, %c0_i32, %c0_i32_0 : i32, i32, i32
  }
  func.func @transform_20(%arg0: i32, %arg1: i32) -> (i32, i32, i32) {
    %c0_i32 = arith.constant 0 : i32
    %c0_i32_0 = arith.constant 0 : i32
    %c0_i32_1 = arith.constant 0 : i32
    return %arg1, %c0_i32, %c0_i32_0 : i32, i32, i32
  }
  func.func @transform_21(%arg0: i32, %arg1: i32) -> (i32, i32, i32) {
    %c0_i32 = arith.constant 0 : i32
    %c0_i32_0 = arith.constant 0 : i32
    %c0_i32_1 = arith.constant 0 : i32
    return %arg1, %c0_i32, %c0_i32_0 : i32, i32, i32
  }
  func.func @transform_22(%arg0: i32, %arg1: i32) -> (i32, i32) {
    %c0_i32 = arith.constant 0 : i32
    %c0_i32_0 = arith.constant 0 : i32
    %c0_i32_1 = arith.constant 0 : i32
    return %c0_i32, %c0_i32_0 : i32, i32
  }
  func.func @transform_23(%arg0: i32, %arg1: i32) -> (i32, i32) {
    %c0_i32 = arith.constant 0 : i32
    %c0_i32_0 = arith.constant 0 : i32
    %c0_i32_1 = arith.constant 0 : i32
    return %c0_i32, %c0_i32_0 : i32, i32
  }
  func.func @transform_24(%arg0: i32, %arg1: i32) -> (i32, i32, i32) {
    %c0_i32 = arith.constant 0 : i32
    %c0_i32_0 = arith.constant 0 : i32
    %c0_i32_1 = arith.constant 0 : i32
    return %arg0, %c0_i32, %c0_i32_0 : i32, i32, i32
  }
}

</mosaic_0001>

<bundles_post_ra>
// kernel: my_transformer_decoder.1
= control target key start
LH: loop header
LB: loop body
LE: loop exit
PB: predicated region body
PF: predicated region fallthrough
CT: control target
= control target key end

     0   :  { %s4294_s0 = inlined_call_operand.vmem [shape: f32[2,8,32], index: 0, kind: input, shape index: {}]   ;;  %s4295_s1 = inlined_call_operand.vmem [shape: f32[2,8,32], index: 1, kind: input, shape index: {}]   ;;  %s4296_s2 = inlined_call_operand.vmem [shape: bf16[2,32,96], index: 2, kind: input, shape index: {}]   ;;  %s4297_s3 = inlined_call_operand.vmem [shape: f32[2,1,96], index: 3, kind: input, shape index: {}]   ;;  %s4298_s4 = inlined_call_operand.vmem [shape: bf16[2,32,32], index: 4, kind: input, shape index: {}]   ;;  %s4299_s5 = inlined_call_operand.hbm [shape: f32[2,1,32], index: 5, kind: input, shape index: {}]   ;;  %s4300_s6 = inlined_call_operand.vmem [shape: bf16[2,32,32], index: 6, kind: input, shape index: {}]   ;;  %s4301_s7 = inlined_call_operand.vmem [shape: f32[2,1,32], index: 7, kind: input, shape index: {}]   ;;  %s4302_s8 = inlined_call_operand.vmem [shape: bf16[2,32,64], index: 8, kind: input, shape index: {}]   ;;  %s4303_s9 = inlined_call_operand.vmem [shape: f32[2,1,64], index: 9, kind: input, shape index: {}]   ;;  %s4304_s10 = inlined_call_operand.vmem [shape: bf16[2,32,32], index: 10, kind: input, shape index: {}]   ;;  %s4305_s11 = inlined_call_operand.vmem [shape: f32[2,1,32], index: 11, kind: input, shape index: {}]   ;;  %s4306_s12 = inlined_call_operand.hbm [shape: bf16[2,32,64], index: 12, kind: input, shape index: {}]   ;;  %s4307_s13 = inlined_call_operand.vmem [shape: f32[2,1,64], index: 13, kind: input, shape index: {}]   ;;  %s4308_s14 = inlined_call_operand.vmem [shape: bf16[2,64,32], index: 14, kind: input, shape index: {}]   ;;  %s4309_s15 = inlined_call_operand.vmem [shape: f32[2,1,32], index: 15, kind: input, shape index: {}]   ;;  %s4310_s16 = inlined_call_operand.vmem [shape: f32[2,1,32], index: 16, kind: input, shape index: {}]   ;;  %s4311_s17 = inlined_call_operand.vmem [shape: f32[2,1,32], index: 17, kind: input, shape index: {}]   ;;  %s4312_s18 = inlined_call_operand.vmem [shape: f32[2,1,32], index: 18, kind: input, shape index: {}]   ;;  %s4313_s19 = inlined_call_operand.vmem [shape: f32[2,1,32], index: 19, kind: input, shape index: {}]   ;;  %s4314_s20 = inlined_call_operand.vmem [shape: f32[2,1,32], index: 20, kind: input, shape index: {}]   ;;  %s4315_s21 = inlined_call_operand.vmem [shape: f32[2,1,32], index: 21, kind: input, shape index: {}]   ;;  %s4316_s22 = inlined_call_operand.vmem [shape: f32[1,32], index: 22, kind: input, shape index: {}]   ;;  %s4317_s23 = inlined_call_operand.vmem [shape: f32[1,32], index: 23, kind: input, shape index: {}]   ;;  %s4318_s24 = inlined_call_operand.vmem [shape: f32[2,8,32], index: 24, kind: output, shape index: {}]  }
   0x1   :  { %4335 = sst [smem:[#allocation24_spill]] %s4294_s0 }
   0x2   :  { %4336 = sst [smem:[#allocation25_spill]] %s4295_s1 }
   0x3   :  { %4337 = sst [smem:[#allocation26_spill]] %s4296_s2 }
   0x4   :  { %4338 = sst [smem:[#allocation27_spill]] %s4297_s3 }
   0x5   :  { %4339 = sst [smem:[#allocation28_spill]] %s4298_s4 }
   0x6   :  { %4340 = sst [smem:[#allocation29_spill]] %s4299_s5 }
   0x7   :  { %4341 = sst [smem:[#allocation30_spill]] %s4300_s6 }
   0x8   :  { %4342 = sst [smem:[#allocation31_spill]] %s4301_s7 }
   0x9   :  { %4343 = sst [smem:[#allocation32_spill]] %s4302_s8 }
   0xa   :  { %4344 = sst [smem:[#allocation33_spill]] %s4304_s10 }
   0xb   :  { %4345 = sst [smem:[#allocation34_spill]] %s4306_s12 }
   0xc   :  { %4346 = sst [smem:[#allocation35_spill]] %s4307_s13 }
   0xd   :  { %4347 = sst [smem:[#allocation36_spill]] %s4308_s14 }
   0xe   :  { %4348 = sst [smem:[#allocation37_spill]] %s4309_s15 }
   0xf   :  { %4349 = sst [smem:[#allocation38_spill]] %s4313_s19 }
  0x10   :  { %4350 = sst [smem:[#allocation39_spill]] %s4314_s20 }
  0x11   :  { %4351 = sst [smem:[#allocation40_spill]] %s4315_s21 }
  0x12   :  { %4352 = sst [smem:[#allocation41_spill]] %s4316_s22 }
  0x13   :  { %4353 = sst [smem:[#allocation42_spill]] %s4317_s23 }
  0x14   :  { %4354 = sst [smem:[#allocation43_spill]] %s4318_s24 }
  0x15   :  { %29 = vsyncpa [#allocation4], 0 }
  0x16   :  { %31 = vsyncpa [#allocation4 + $0x1], 0 }
  0x17   :  { %32 = vsyncpa [#allocation6], 0 }
  0x18   :  { %34 = vsyncpa [#allocation6 + $0x1], 0  ;;  %s3699_s5 = smov 0   ;;  %s3701_s26 = smov 0  }
  0x19   :  { %s3703_s27 = smov 0   ;;  %s3705_s28 = smov 0  }
  0x1a   :  { %s3707_s6 = smov 0   ;;  %s3709_s2 = smov 0  }
  0x1b   :  { %s3711_s29 = smov 0   ;;  %s3713_s0 = smov 0  }
  0x1c LB: > { %4355 = sst [smem:[#allocation9_spill]] %s3528_s26  ;;  %s2971_s7 = sadd.s32 4294967295, %s3552_s0   ;;  %s3552_s0 = sphi %s3713_s0, %s40_s0   ;;  %s3548_s29 = sphi %s3711_s29, %s4428_s29   ;;  %s3544_s2 = sphi %s3709_s2, %s4427_s2   ;;  %s3540_s6 = sphi %s3707_s6, %s4426_s6   ;;  %s3536_s28 = sphi %s3705_s28, %s4425_s28   ;;  %s3532_s27 = sphi %s3703_s27, %s4424_s27   ;;  %s3528_s26 = sphi %s3701_s26, %s4423_s26   ;;  %s3524_s5 = sphi %s3699_s5, %s4422_s5  }
  0x1d   : > { %4356 = sst [smem:[#allocation10_spill]] %s3532_s27  ;;  %s49_s30 = sadd.s32 1, %s3544_s2 }
  0x1e   : > { %4357 = sst [smem:[#allocation11_spill]] %s3536_s28  ;;  %p50_p0 = scmp.ge.s32.totalorder %s49_s30, 2 }
  0x1f   : > { %4358 = sst [smem:[#allocation12_spill]] %s3544_s2  ;;  %s52_s3 = sadd.s32 1, %s3548_s29 }
  0x20   : > { %4359 = sst [smem:[#allocation13_spill]] %s3548_s29  ;;  %s189_s25 = sadd.s32 1, %s3532_s27 }
  0x21   : > { %4360 = sst [smem:[#allocation14_spill]] %s3552_s0  ;;  %p196_p1 = scmp.ne.s32.totalorder %s3532_s27, %s3528_s26 }
  0x22   : > { %s4430_s30 = smov (%p50_p0, %s49_s30), 0  ;;  %s4432_s3 = smov (!%p50_p0, %s52_s3), %s3548_s29 }
  0x23   : > { %4361 = sst [smem:[#allocation15_spill]] %s4430_s30  ;;  %s186_s8 = ssub.s32 %s3544_s2, %s4430_s30 }
  0x24   : > { %p197_p2 = scmp.eq.s32.totalorder %s3552_s0, 0  ;;  %p54_p3 = scmp.ge.s32.totalorder %s4432_s3, 2 }
  0x25   : > { %p187_p4 = scmp.eq.s32.totalorder %s186_s8, 0  ;;  %p202_p6 = scmp.ne.s32.totalorder %s3528_s26, %s3524_s5 }
  0x26   : > { %p3749_p5 = por %p197_p2, %p196_p1  ;;  %s4434_s3 = smov (%p54_p3, %s4432_s3), 0 }
  0x27   : > { %4363 = sst [smem:[#allocation16_spill]] %s4434_s3  ;;  %p203_p7 = scmp.eq.s32.totalorder %s2971_s7, 0 }
  0x28   : > { %s3757_s1 = scalar_select %p187_p4, %s3532_s27, %s189_s25  }
  0x29   : > { %p3283_p8 = scmp.lt.s32.totalorder %s3552_s0, 4  ;;  %s3761_s23 = sand.u32 1, %s3532_s27  }
  0x2a   : > { %4364 = sst [smem:[#allocation17_spill]] %s3757_s1  ;;  %p3763_p9 = por %p203_p7, %p202_p6 }
  0x2b   : > { %s2975_s8 = sshll.u32 %s3544_s2, 4  ;;  %s4366_s24 = sld [smem:[#allocation29_spill]] }
  0x2c   : > { %s4365_s30 = scalar_select %p3763_p9, 1, 0 }
  0x2d   : > { %s755_s5 = scalar_lea.vmem [#allocation3], %s3761_s23  ;;  %p3778_p10 = pnand %p3283_p8, %p3749_p5 }
  0x2e   : > { %s762_s7 = sshll.u32 %s755_s5, 4  ;;  %s753_s22 = scalar_lea.sflag [#allocation4], %s3761_s23  ;;  %s3774_s7 = int_to_ptr.vmem [resolvable:$true] %s762_s7 }
  0x2f   : > { %p3424_p0 = pneg %p3778_p10 }
  0x31   : > { %s3771_s21 = scalar_lea.hbm %s4366_s24, %s2975_s8  ;;  %s3427_s4 = scalar_lea.hbm %s4366_s24, 32 }
  0x32   : > { %s3422_s29 = scalar_lea.hbm %s3771_s21, 16  ;;  %p3428_p3 = scmp.lt.u32.totalorder %s3771_s21, %s4366_s24 }
  0x33   : > { %p3423_p13 = scmp.ne.s32.totalorder %s3771_s21, %s3422_s29  ;;  %p3429_p4 = scmp.lt.u32.totalorder %s3427_s4, %s3422_s29 }
  0x34   : > { %p3431_p6 = scmp.lt.u32.totalorder %s3422_s29, %s3771_s21 }
  0x35   : > { %p3425_p1 = pnand %p3424_p0, %p3423_p13  ;;  %p3430_p5 = por %p3429_p4, %p3428_p3 }
  0x37   : > { %p3426_p2 = pneg %p3425_p1  ;;  %p3432_p7 = por %p3431_p6, %p3430_p5 }
  0x39   : > { %p3433_p8 = pnand %p3432_p7, %p3426_p2 }
  0x3b   : > { %3436 = shalt.err (!%p3433_p8)
}
  0x3c   : > { %s3437_s27 = scalar_lea.vmem %s3774_s7, 16  ;;  %s3554_s8 = smov [#allocation3]  }
  0x3d   : > { %p3438_p13 = scmp.ne.s32.totalorder %s3774_s7, %s3437_s27  ;;  %s3442_s5 = sshll.u32 %s3554_s8, 4  ;;  %s3443_s5 = int_to_ptr.vmem [resolvable:$false] %s3442_s5 }
  0x3e   : > { %s3444_s3 = scalar_lea.vmem %s3443_s5, 32  ;;  %p3445_p12 = scmp.lt.s32.totalorder %s3774_s7, %s3443_s5 }
  0x3f   : > { %p3440_p1 = pnand %p3438_p13, %p3424_p0  ;;  %p3446_p3 = scmp.lt.s32.totalorder %s3444_s3, %s3437_s27 }
  0x41   : > { %p3441_p11 = pneg %p3440_p1  ;;  %p3447_p4 = por %p3446_p3, %p3445_p12 }
  0x43   : > { %p3448_p5 = pnand %p3447_p4, %p3441_p11 }
  0x45   : > { %3451 = shalt.err (!%p3448_p5)
}
  0x46   : > { %3279 = dma.hbm_to_vmem [thread:$0]  (!%p3778_p10), %s3771_s21, 16, %s3774_s7, %s753_s22  }
  0x47   : > { %p4368_p2 = scmp.lt.s32.totalorder %s3552_s0, 5  ;;  %p4369_p6 = scmp.ge.s32.totalorder %s3552_s0, 1 }
  0x48   : > { %s2976_s27 = sshll.u32 %s3761_s23, 4  ;;  %s3054_s29 = sshll.u32 %s3544_s2, 8 }
  0x49   : > { %p3814_p7 = pnand %p4369_p6, %p4368_p2  ;;  %s4371_s12 = sld [smem:[#allocation34_spill]] }
  0x4a   : > { %s815_s3 = scalar_lea.vmem [#allocation5], %s2976_s27  ;;  %s812_s21 = scalar_lea.sflag [#allocation6], %s3761_s23 }
  0x4b   : > { %s822_s24 = sshll.u32 %s815_s3, 4  ;;  %s3825_s24 = int_to_ptr.vmem [resolvable:$true] %s822_s24 }
  0x4f   : > { %s3823_s5 = scalar_lea.hbm %s4371_s12, %s3054_s29  ;;  %s3457_s29 = scalar_lea.hbm %s4371_s12, 512 }
  0x50   : > { %s3452_s7 = scalar_lea.hbm %s3823_s5, 256  ;;  %p3458_p13 = scmp.lt.u32.totalorder %s3823_s5, %s4371_s12 }
  0x51   : > { %p3453_p11 = scmp.ne.s32.totalorder %s3823_s5, %s3452_s7  ;;  %p3459_p1 = scmp.lt.u32.totalorder %s3457_s29, %s3452_s7 }
  0x52   : > { %p3461_p4 = scmp.lt.u32.totalorder %s3452_s7, %s3823_s5 }
  0x53   : > { %p3455_p12 = pnand %p3453_p11, %p3424_p0  ;;  %p3460_p3 = por %p3459_p1, %p3458_p13 }
  0x55   : > { %p3456_p8 = pneg %p3455_p12  ;;  %p3462_p5 = por %p3461_p4, %p3460_p3 }
  0x57   : > { %p3463_p2 = pnand %p3462_p5, %p3456_p8 }
  0x59   : > { %3466 = shalt.err (!%p3463_p2)
}
  0x5a   : > { %s3467_s27 = scalar_lea.vmem %s3825_s24, 256  ;;  %s3555_s2 = smov [#allocation5]  }
  0x5b   : > { %p3468_p6 = scmp.ne.s32.totalorder %s3825_s24, %s3467_s27  ;;  %s3472_s3 = sshll.u32 %s3555_s2, 4  ;;  %s3473_s3 = int_to_ptr.vmem [resolvable:$false] %s3472_s3 }
  0x5c   : > { %s3474_s22 = scalar_lea.vmem %s3473_s3, 512  ;;  %p3475_p9 = scmp.lt.s32.totalorder %s3825_s24, %s3473_s3 }
  0x5d   : > { %p3470_p11 = pnand %p3468_p6, %p3424_p0  ;;  %p3476_p13 = scmp.lt.s32.totalorder %s3474_s22, %s3467_s27 }
  0x5f   : > { %p3471_p12 = pneg %p3470_p11  ;;  %p3477_p1 = por %p3476_p13, %p3475_p9 }
  0x61   : > { %p3478_p3 = pnand %p3477_p1, %p3471_p12 }
  0x63   : > { %3481 = shalt.err (!%p3478_p3)
}
  0x64   : > { %s3556_s7 = smov 64   ;;  %s3557_s29 = smov 4  }
  0x65   : > { %3282 = dma.hbm_to_vmem [thread:$0]  (!%p3778_p10), %s3823_s5, 256, %s3825_s24, %s812_s21, %s3556_s7, %s3556_s7, %s3557_s29  }
  0x66   : > { %890 = sbr.rel (%p3814_p7) target bundleno = 4447 (0x115f), region = 116 }
  0x6d   : > { %s3856_s4 = sand.u32 1, %s3528_s26   ;;  %p4373_p9 = scmp.ne.s32.totalorder %s4365_s30, 0 }
  0x6e   : > { %4372 = sst [smem:[#allocation18_spill]] %s3856_s4  ;;  %s893_s8 = scalar_lea.sflag [#allocation4], %s3856_s4 }
  0x6f   : > { %3515 = dma.done.wait (%p4373_p9), %s893_s8, 16  }
  0x70   : > { %3517 = vsyncadd (%p4373_p9), %s893_s8, 4294967280  ;;  %s2980_s23 = sshll.u32 %s3856_s4, 4  ;;  %s901_s24 = scalar_lea.sflag [#allocation6], %s3856_s4 }
  0x71   : > { %s3866_s25 = scalar_lea.vmem [#allocation5], %s2980_s23 }
  0x72   : > { %4374 = sst [smem:[#allocation19_spill]] %s3866_s25 }
  0x73   : > { %3519 = dma.done.wait (%p4373_p9), %s901_s24, 256  }
  0x74   : > { %3521 = vsyncadd (%p4373_p9), %s901_s24, 4294967040  ;;  %p1046_p10 = scmp.lt.s32.totalorder %s3540_s6, 1  ;;  %p1054_p0 = scmp.lt.s32.totalorder %s3536_s28, 1 }
  0x75   : > { %s4375_s2 = sld [smem:[#allocation24_spill]]  ;;  %s4376_s29 = sld [smem:[#allocation25_spill]] }
  0x76   : > { %s4436_s6 = smov (!%p1046_p10, %s3540_s6), 1  ;;  %s4386_s10 = sld [smem:[#allocation33_spill]] }
  0x77   : > { %s3876_s1 = scalar_select %p1054_p0, %s3536_s28, 1 }
  0x78   : > { %s2981_s5 = sshll.u32 %s4436_s6, 3  ;;  %s4378_s6 = sld [smem:[#allocation26_spill]] }
  0x79   : > { %s3055_s23 = sshll.u32 %s3876_s1, 4  ;;  %s4382_s28 = sld [smem:[#allocation30_spill]] }
  0x7a   : > { %s3060_s0 = sshll.u32 %s3876_s1, 5  ;;  %s4388_s14 = sld [smem:[#allocation36_spill]] }
  0x7b   : > { %s1049_s3 = scalar_lea.vmem %s4375_s2, %s2981_s5  ;;  %s1053_s8 = scalar_lea.vmem %s4376_s29, %s2981_s5 }
  0x7c   : > { %s4380_s2 = sld [smem:[#allocation28_spill]]  ;;  %s3920_s7 = scalar_lea.vmem %s4386_s10, %s3055_s23 }
  0x7d   : > { %s1110_s24 = scalar_lea.vmem %s4312_s18, %s3876_s1  ;;  %s4392_s19 = sld [smem:[#allocation39_spill]] }
  0x7e   : > { %s3892_s4 = scalar_lea.vmem %s4378_s6, %s3055_s23  ;;  %s4385_s6 = sld [smem:[#allocation32_spill]] }
  0x7f   : > { %4379 = sst [smem:[#allocation20_spill]] %s3892_s4  ;;  %s3902_s20 = scalar_lea.vmem %s4382_s28, %s3055_s23 }
  0x80   : > { %4383 = sst [smem:[#allocation22_spill]] %s3902_s20  ;;  %s3934_s26 = scalar_lea.vmem %s4388_s14, %s3060_s0 }
  0x81   : > { %4389 = sst [smem:[#allocation23_spill]] %s3934_s26  ;;  %s4391_s0 = sld [smem:[#allocation38_spill]] }
  0x82   : > { %s3897_s22 = scalar_lea.vmem %s4380_s2, %s3055_s23  ;;  %s4394_s28 = sld [smem:[#allocation43_spill]] }
  0x83   : > { %4381 = sst [smem:[#allocation21_spill]] %s3897_s22  ;;  %s1116_s21 = scalar_lea.vmem %s4392_s19, %s3876_s1 }
  0x84   : > { %s3911_s4 = scalar_lea.vmem %s4385_s6, %s3055_s23  ;;  %s4393_s23 = sld [smem:[#allocation40_spill]] }
  0x85   : > { %s4395_s20 = sld [smem:[#allocation11_spill]] }
  0x87   : > { %s1113_s6 = scalar_lea.vmem %s4391_s0, %s3876_s1 }
  0x88   : > { %s3967_s29 = scalar_lea.vmem %s4394_s28, %s2981_s5 }
  0x8a   : > { %s1119_s2 = scalar_lea.vmem %s4393_s23, %s3876_s1 }
  0x8b   : > { %p2996_p7 = scmp.ne.s32.totalorder %s4395_s20, 0 }
  0x8c   : > { %v1129_v0 = vld [vmem:[%s1049_s3] sm:$0xff] (!%p2996_p7)  ;;  %vm1130_vm0 = vcmask (!%p2996_p7), 261120  }
  0x8d   : > { %1128 = sbr.rel (%p2996_p7) target bundleno = 148 (0x94), region = 128  ;;  %v1132_v1 = vld [vmem:[%s1053_s8] sm:$0xff] (!%p2996_p7)  ;;  %1131 = vst.msk [vmem:[%s3967_s29] sm:$0xff] (!%p2996_p7), %vm1130_vm0, %v1129_v0 }
  0x8e   : > { %1133 = vst.msk [vmem:[#allocation2] sm:$0xff] (!%p2996_p7), %vm1130_vm0, %v1132_v1 }
  0x94 PF: > { %s4396_s10 = sld [smem:[#allocation20_spill]]  ;;  %v3558_v3 = vmov 0.0   ;;  %vm3559_vm1 = vmmov 0   ;;  %v3978_v5 = vld [vmem:[%s3967_s29] sm:$0xff]  ;;  %vm1161_vm2 = vcmask 261120   ;;  %s4397_s15 = sld [smem:[#allocation27_spill]] }
  0x95   : > { %3116 = vmatprep.subr.bf16.mxu1 %v3558_v3  ;;  %3130 = vmatprep.subr.bf16.mxu0 %v3558_v3  ;;  %v1136_v6 = vpack.c.bf16 %v3978_v5, %v3978_v5  ;;  %s3560_s26 = smov 120   ;;  %s3561_s5 = smov 96   ;;  %vm1209_vm3 = vcmask 64512   ;;  %vm1271_vm4 = vcmask 1043456   ;;  %vm1660_vm5 = vcmask 130048  }
  0x96   : > { %3120 = vmatprep.mubr.msk.bf16.mxu1 %vm3559_vm1, %v3558_v3  ;;  %3132 = vmatprep.mubr.msk.bf16.mxu0 %vm3559_vm1, %v3558_v3  ;;  %s3562_s3 = smov 80   ;;  %s3563_s8 = smov 88   ;;  %vm1662_vm6 = vcmask 195584   ;;  %vm2555_vm7 = vcmask 523264   ;;  %vm2634_vm8 = vcmask 260096  }
  0x97   : > { %s3564_s30 = smov 72   ;;  %s3565_s22 = smov 112  }
  0x98   : > { %s3566_s27 = smov 104   ;;  %s3567_s12 = smov 56  }
  0x99   : > { %s3568_s25 = smov 64   ;;  %s3569_s0 = smov 40  }
  0x9a   : > { %v3366_v2 = vld [vmem:[%s4396_s10] sm:$0xff]   ;;  %v3367_v4 = vld [vmem:[%s4396_s10 + $0x8] sm:$0xff]   ;;  %s4398_s20 = scalar_lea.vmem %s4397_s15, %s3876_s1  ;;  %s3570_s19 = smov 48  }
  0x9b   : > { %3117 = vmatpush3.bf16.msra.mxu1 %v3366_v2  ;;  %v2997_v7 = vld [vmem:[%s4398_s20] ss:$0 sm:$0xff]  ;;  %s4399_s23 = sld [smem:[#allocation21_spill]]  ;;  %s3571_s28 = smov 8  }
  0x9c   : > { %3118 = vmatprep.subr.bf16.mxu1 %v3558_v3  ;;  %s3572_s10 = smov 16   ;;  %s3573_s13 = smov 24  }
  0x9d   : > { %s4400_s14 = sld [smem:[#allocation18_spill]]  ;;  %s4402_s20 = sld [smem:[#allocation22_spill]] }
  0x9f   : > { %3119 = vmatpush3.bf16.msra.mxu1 %v3367_v4 }
  0xa0   : > { %3124 = vmatprep.subr.bf16.mxu1 %v3558_v3 }
  0xa2   : > { %3121 = vmatmul.mubr.msk.bf16.vlgmr.msra.gmra.mrb[0].mxu1 %vm1161_vm2, %v1136_v6 }
  0xa3   : > { %3126 = vmatprep.mubr.msk.bf16.mxu1 %vm3559_vm1, %v3558_v3  ;;  %s4401_s15 = scalar_lea.vmem [#allocation3], %s4400_s14 }
 0x175   : > { %v1199_v8 = vpop.f32.mrb[0].mxu1 }
 0x176   : > { %v1200_v9 = vadd.f32 %v2997_v7, %v1199_v8  ;;  %v3122_v10 = vpop.f32.mrb[1].mxu1 }
 0x177   : > { %v1202_v11 = vpop.f32.mrb[2].mxu1 }
 0x178   : > { %v3994_v12 = vpack.c.bf16 %v1200_v9, %v1200_v9  ;;  %v3123_v13 = vpop.f32.mrb[3].mxu1 }
 0x17a   : > { %1317 = vrot.lane.b32.xlu1 %v3994_v12, %s3560_s26  ;;  %1207 = vrot.lane.b32.xlu0 %v3994_v12, %s3561_s5 }
 0x17e   : > { %1429 = vrot.lane.b32.xlu1 %v3994_v12, %s3562_s3  ;;  %1319 = vrot.lane.b32.xlu0 %v3994_v12, %s3563_s8 }
 0x182   : > { %1539 = vrot.lane.b32.xlu1 %v3994_v12, %s3564_s30  ;;  %1427 = vrot.lane.b32.xlu0 %v3994_v12, %s3565_s22 }
 0x186   : > { %1537 = vrot.lane.b32.xlu0 %v3994_v12, %s3566_s27 }
 0x1ec   : > { %v1208_v14 = vpop.permute.xlu0 %1207  ;;  %v1318_v17 = vpop.permute.xlu1 %1317 }
 0x1ed   : > { %v1214_v15 = vsel %vm1209_vm3, %v1208_v14, 0 }
 0x1ee   : > { %3125 = vmatpush3.bf16.xpose.msra.mxu1 %v1214_v15 }
 0x1ef   : > { %3136 = vmatprep.subr.bf16.mxu1 %v3558_v3 }
 0x1f0   : > { %v1320_v16 = vpop.permute.xlu0 %1319  ;;  %v1430_v19 = vpop.permute.xlu1 %1429 }
 0x1f1   : > { %v1325_v18 = vsel %vm1209_vm3, %v1320_v16, 0  ;;  %v1435_v20 = vsel %vm1209_vm3, %v1430_v19, 0 }
 0x1f4   : > { %v1540_v21 = vpop.permute.xlu1 %1539  ;;  %v1428_v22 = vpop.permute.xlu0 %1427 }
 0x1f5   : > { %3127 = vmatmul.mubr.msk.bf16.vlgmr.msra.gmra.mrb[4].mxu1 %vm1209_vm3, %v3994_v12  ;;  %v1545_v23 = vsel %vm1209_vm3, %v1540_v21, 0 }
 0x1f6   : > { %3137 = vmatpush3.bf16.xpose.msra.mxu1 %v1325_v18  ;;  %3138 = vmatprep.mubr.msk.bf16.mxu1 %vm3559_vm1, %v3558_v3 }
 0x1f7   : > { %3148 = vmatprep.subr.bf16.mxu1 %v3558_v3 }
 0x1f8   : > { %v1538_v24 = vpop.permute.xlu0 %1537 }
 0x1fd   : > { %3139 = vmatmul.mubr.msk.bf16.vlgmr.msra.gmra.mrb[8].mxu1 %vm1209_vm3, %v1318_v17 }
 0x1fe   : > { %3149 = vmatpush3.bf16.xpose.msra.mxu1 %v1435_v20  ;;  %3150 = vmatprep.mubr.msk.bf16.mxu1 %vm3559_vm1, %v3558_v3 }
 0x1ff   : > { %3160 = vmatprep.subr.bf16.mxu1 %v3558_v3 }
 0x205   : > { %3151 = vmatmul.mubr.msk.bf16.vlgmr.msra.gmra.mrb[12].mxu1 %vm1209_vm3, %v1428_v22 }
 0x206   : > { %3161 = vmatpush3.bf16.xpose.msra.mxu1 %v1545_v23  ;;  %3162 = vmatprep.mubr.msk.bf16.mxu1 %vm3559_vm1, %v3558_v3 }
 0x207   : > { %3172 = vmatprep.subr.bf16.mxu1 %v3558_v3 }
 0x20d   : > { %3163 = vmatmul.mubr.msk.bf16.vlgmr.msra.gmra.mrb[16].mxu1 %vm1209_vm3, %v1538_v24 }
 0x20e   : > { %3176 = vmatprep.mubr.msk.bf16.mxu1 %vm3559_vm1, %v3558_v3 }
 0x2c8   : > { %v1250_v25 = vpop.f32.mrb[4].mxu1 }
 0x2c9   : > { %v3128_v26 = vpop.f32.mrb[5].mxu1  ;;  %v1256_v27 = vsel %vm1209_vm3, %v1250_v25, -inf }
 0x2ca   : > { %1257 = vmax.xlane.f32.xlu1 %v1256_v27  ;;  %v1253_v28 = vpop.f32.mrb[6].mxu1  ;;  %v3368_v27 = vld [vmem:[%s4399_s23] sm:$0xff]  }
 0x2cb   : > { %v3129_v29 = vpop.f32.mrb[7].mxu1  ;;  %3173 = vmatpush3.bf16.msra.mxu1 %v3368_v27 }
 0x2cc   : > { %3174 = vmatprep.subr.bf16.mxu1 %v3558_v3  ;;  %v3369_v29 = vld [vmem:[%s4399_s23 + $0x8] sm:$0xff]   ;;  %s4404_s23 = scalar_lea.vmem %s4311_s17, %s3876_s1 }
 0x2cf   : > { %3175 = vmatpush3.bf16.msra.mxu1 %v3369_v29 }
 0x2d0   : > { %v1361_v30 = vpop.f32.mrb[8].mxu1  ;;  %3188 = vmatprep.subr.bf16.mxu1 %v3558_v3 }
 0x2d1   : > { %v3140_v31 = vpop.f32.mrb[9].mxu1  ;;  %v1367_v32 = vsel %vm1209_vm3, %v1361_v30, -inf }
 0x2d2   : > { %1368 = vmax.xlane.f32.xlu0 %v1367_v32  ;;  %v1364_v33 = vpop.f32.mrb[10].mxu1 }
 0x2d3   : > { %v3141_v34 = vpop.f32.mrb[11].mxu1 }
 0x2d8   : > { %v1471_v35 = vpop.f32.mrb[12].mxu1 }
 0x2d9   : > { %v3152_v36 = vpop.f32.mrb[13].mxu1  ;;  %v1477_v37 = vsel %vm1209_vm3, %v1471_v35, -inf }
 0x2da   : > { %1478 = vmax.xlane.f32.xlu0 %v1477_v37  ;;  %v1474_v38 = vpop.f32.mrb[14].mxu1 }
 0x2db   : > { %1377 = vrot.lane.b32.xlu1 %v3994_v12, %s3567_s12  ;;  %v3153_v39 = vpop.f32.mrb[15].mxu1 }
 0x2e0   : > { %v1581_v40 = vpop.f32.mrb[16].mxu1 }
 0x2e1   : > { %v3164_v41 = vpop.f32.mrb[17].mxu1  ;;  %v1587_v44 = vsel %vm1209_vm3, %v1581_v40, -inf }
 0x2e2   : > { %v1584_v42 = vpop.f32.mrb[18].mxu1 }
 0x2e3   : > { %v3165_v43 = vpop.f32.mrb[19].mxu1 }
 0x2f0   : > { %1266 = vrot.lane.b32.xlu0 %v3994_v12, %s3568_s25  ;;  %s4403_s25 = scalar_lea.vmem %s4310_s16, %s3876_s1 }
 0x2f4   : > { %1597 = vrot.lane.b32.xlu0 %v3994_v12, %s3569_s0 }
 0x2ff   : > { %1588 = vmax.xlane.f32.xlu1 %v1587_v44 }
 0x310   : > { %1487 = vrot.lane.b32.xlu1 %v3994_v12, %s3570_s19  ;;  %s4412_s19 = sld [smem:[#allocation35_spill]] }
 0x357   : > { %v1258_v45 = vpop.xlane.xlu1 %1257 }
 0x358   : > { %v1259_v46 = vsub.f32 %v1250_v25, %v1258_v45 }
 0x35a   : > { %v1260_v47 = vmul.f32 1.442695, %v1259_v46 }
 0x35b   : > { %v1378_v57 = vpop.permute.xlu1 %1377 }
 0x35c   : > { %3382 = vpow2.f32 %v1260_v47  ;;  %v1383_v61 = vsel %vm1271_vm4, %v1378_v57, 0 }
 0x35f   : > { %v1369_v48 = vpop.xlane.xlu0 %1368 }
 0x360   : > { %v1370_v49 = vsub.f32 %v1361_v30, %v1369_v48 }
 0x362   : > { %v1371_v50 = vmul.f32 1.442695, %v1370_v49 }
 0x364   : > { %3384 = vpow2.f32 %v1371_v50 }
 0x366   : > { %v3383_v54 = vpop.eup %3382 }
 0x367   : > { %v1479_v51 = vpop.xlane.xlu0 %1478  ;;  %v1265_v59 = vpack.c.bf16 %v3383_v54, %v3383_v54  ;;  %v1262_v62 = vsel %vm1209_vm3, %v3383_v54, 0.0 }
 0x368   : > { %v1480_v52 = vsub.f32 %v1471_v35, %v1479_v51 }
 0x36a   : > { %v1481_v53 = vmul.f32 1.442695, %v1480_v52  ;;  %v3009_v52 = vld [vmem:[%s4401_s15] ss:$0 sm:$0xff]  ;;  %s4414_s15 = sld [smem:[#allocation37_spill]] }
 0x36b   : > { %v1267_v55 = vpop.permute.xlu0 %1266 }
 0x36c   : > { %3386 = vpow2.f32 %v1481_v53  ;;  %v1273_v56 = vsel %vm1271_vm4, %v1267_v55, 0 }
 0x36d   : > { %3131 = vmatpush3.bf16.msra.mxu0 %v1273_v56 }
 0x36e   : > { %v3385_v58 = vpop.eup %3384  ;;  %3142 = vmatprep.subr.bf16.mxu0 %v3558_v3 }
 0x36f   : > { %v1373_v60 = vsel %vm1209_vm3, %v3385_v58, 0.0  ;;  %v1376_v0 = vpack.c.bf16 %v3385_v58, %v3385_v58  ;;  %v1598_v9 = vpop.permute.xlu0 %1597 }
 0x370   : > { %3133 = vmatmul.mubr.msk.bf16.vlgmr.msra.gmra.mrb[0].mxu0 %vm1209_vm3, %v1265_v59  ;;  %1374 = vadd.xlane.f32.xlu1 %v1373_v60  ;;  %v1603_v11 = vsel %vm1271_vm4, %v1598_v9, 0 }
 0x371   : > { %3143 = vmatpush3.bf16.msra.mxu0 %v1383_v61  ;;  %3144 = vmatprep.mubr.msk.bf16.mxu0 %vm3559_vm1, %v3558_v3 }
 0x372   : > { %3154 = vmatprep.subr.bf16.mxu0 %v3558_v3 }
 0x374   : > { %1263 = vadd.xlane.f32.xlu1 %v1262_v62 }
 0x376   : > { %v3387_v63 = vpop.eup %3386 }
 0x377   : > { %v1483_v1 = vsel %vm1209_vm3, %v3387_v63, 0.0  ;;  %v1486_v10 = vpack.c.bf16 %v3387_v63, %v3387_v63 }
 0x378   : > { %1484 = vadd.xlane.f32.xlu0 %v1483_v1  ;;  %3145 = vmatmul.mubr.msk.bf16.vlgmr.msra.gmra.mrb[4].mxu0 %vm1209_vm3, %v1376_v0  ;;  %v3370_v1 = vld [vmem:[%s3911_s4] sm:$0xff]  }
 0x379   : > { %3156 = vmatprep.mubr.msk.bf16.mxu0 %vm3559_vm1, %v3558_v3 }
 0x38c   : > { %v1589_v2 = vpop.xlane.xlu1 %1588 }
 0x38d   : > { %v1590_v4 = vsub.f32 %v1581_v40, %v1589_v2  ;;  %v3371_v2 = vld [vmem:[%s3911_s4 + $0x8] sm:$0xff]  }
 0x38f   : > { %v1591_v6 = vmul.f32 1.442695, %v1590_v4  ;;  %v4084_v4 = vld [vmem:[#allocation2] sm:$0xff] }
 0x390   : > { %v1488_v7 = vpop.permute.xlu1 %1487 }
 0x391   : > { %3388 = vpow2.f32 %v1591_v6  ;;  %v1493_v8 = vsel %vm1271_vm4, %v1488_v7, 0  ;;  %v3372_v6 = vld [vmem:[%s4402_s20] sm:$0xff]   ;;  %v3373_v7 = vld [vmem:[%s4402_s20 + $0x8] sm:$0xff]   ;;  %s4405_s20 = scalar_lea.vmem %s4303_s9, %s3876_s1 }
 0x392   : > { %3155 = vmatpush3.bf16.msra.mxu0 %v1493_v8 }
 0x393   : > { %3166 = vmatprep.subr.bf16.mxu0 %v3558_v3 }
 0x395   : > { %3157 = vmatmul.mubr.msk.bf16.vlgmr.msra.gmra.mrb[8].mxu0 %vm1209_vm3, %v1486_v10 }
 0x396   : > { %3167 = vmatpush3.bf16.msra.mxu0 %v1603_v11  ;;  %3168 = vmatprep.mubr.msk.bf16.mxu0 %vm3559_vm1, %v3558_v3 }
 0x397   : > { %3180 = vmatprep.subr.bf16.mxu0 %v3558_v3 }
 0x39b   : > { %v3389_v12 = vpop.eup %3388 }
 0x39c   : > { %v1593_v13 = vsel %vm1209_vm3, %v3389_v12, 0.0  ;;  %v1596_v14 = vpack.c.bf16 %v3389_v12, %v3389_v12  ;;  %v3013_v12 = vld [vmem:[%s4403_s25] ss:$0 sm:$0xff]  ;;  %s4406_s25 = sld [smem:[#allocation31_spill]] }
 0x39d   : > { %1594 = vadd.xlane.f32.xlu0 %v1593_v13 }
 0x39e   : > { %3169 = vmatmul.mubr.msk.bf16.vlgmr.msra.gmra.mrb[12].mxu0 %vm1209_vm3, %v1596_v14  ;;  %v3014_v14 = vld [vmem:[%s4404_s23] ss:$0 sm:$0xff]  ;;  %s4413_s23 = scalar_lea.vmem %s4412_s19, %s3876_s1 }
 0x39f   : > { %3184 = vmatprep.mubr.msk.bf16.mxu0 %vm3559_vm1, %v3558_v3  ;;  %3181 = vmatpush3.bf16.msra.mxu0 %v3372_v6 }
 0x3a0   : > { %3182 = vmatprep.subr.bf16.mxu0 %v3558_v3 }
 0x3a2   : > { %s4407_s0 = scalar_lea.vmem %s4406_s25, %s3876_s1 }
 0x3a3   : > { %3183 = vmatpush3.bf16.msra.mxu0 %v3373_v7 }
 0x3a4   : > { %3196 = vmatprep.subr.bf16.mxu0 %v3558_v3 }
 0x3fd   : > { %v1375_v15 = vpop.xlane.xlu1 %1374 }
 0x3fe   : > { %3390 = vrcp.f32 %v1375_v15 }
 0x401   : > { %v1264_v42 = vpop.xlane.xlu1 %1263 }
 0x405   : > { %v1485_v26 = vpop.xlane.xlu0 %1484 }
 0x406   : > { %3392 = vrcp.f32 %v1485_v26  ;;  %v3015_v26 = vld [vmem:[%s4407_s0] ss:$0 sm:$0xff] }
 0x408   : > { %v3391_v20 = vpop.eup %3390 }
 0x410   : > { %v3393_v30 = vpop.eup %3392 }
 0x42a   : > { %v1595_v28 = vpop.xlane.xlu0 %1594 }
 0x42b   : > { %3394 = vrcp.f32 %v1595_v28 }
 0x42c   : > { %3396 = vrcp.f32 %v1264_v42 }
 0x435   : > { %v3395_v36 = vpop.eup %3394 }
 0x436   : > { %v3397_v43 = vpop.eup %3396 }
 0x443   : > { %v1309_v16 = vpop.f32.mrb[0].mxu0 }
 0x444   : > { %v3134_v17 = vpop.f32.mrb[1].mxu0  ;;  %v1316_v46 = vmul.f32 %v3397_v43, %v1309_v16 }
 0x445   : > { %v1312_v18 = vpop.f32.mrb[2].mxu0 }
 0x446   : > { %v3135_v19 = vpop.f32.mrb[3].mxu0  ;;  %v3019_v18 = vld [vmem:[%s4405_s20] ss:$0 sm:$0xff]  ;;  %s4415_s20 = scalar_lea.vmem %s4414_s15, %s3876_s1 }
 0x44b   : > { %v1419_v21 = vpop.f32.mrb[4].mxu0 }
 0x44c   : > { %v1426_v22 = vmul.f32 %v3391_v20, %v1419_v21  ;;  %v3146_v23 = vpop.f32.mrb[5].mxu0 }
 0x44d   : > { %v1422_v24 = vpop.f32.mrb[6].mxu0 }
 0x44e   : > { %v3147_v25 = vpop.f32.mrb[7].mxu0  ;;  %1648 = vrot.lane.b32.xlu0 %v1426_v22, %s3571_s28 }
 0x468   : > { %v1529_v31 = vpop.f32.mrb[8].mxu0 }
 0x469   : > { %v1536_v32 = vmul.f32 %v3393_v30, %v1529_v31  ;;  %v3158_v33 = vpop.f32.mrb[9].mxu0 }
 0x46a   : > { %v1532_v34 = vpop.f32.mrb[10].mxu0 }
 0x46b   : > { %1652 = vrot.lane.b32.xlu1 %v1536_v32, %s3572_s10  ;;  %v3159_v35 = vpop.f32.mrb[11].mxu0 }
 0x471   : > { %v1639_v37 = vpop.f32.mrb[12].mxu0 }
 0x472   : > { %v1646_v38 = vmul.f32 %v3395_v36, %v1639_v37  ;;  %v3170_v39 = vpop.f32.mrb[13].mxu0 }
 0x473   : > { %v1642_v40 = vpop.f32.mrb[14].mxu0 }
 0x474   : > { %1656 = vrot.lane.b32.xlu1 %v1646_v38, %s3573_s13  ;;  %v3171_v41 = vpop.f32.mrb[15].mxu0 }
 0x4c0   : > { %v1649_v44 = vpop.permute.xlu0 %1648 }
 0x4c1   : > { %v1659_v47 = vsel %vm1209_vm3, %v1316_v46, %v1649_v44 }
 0x4dd   : > { %v1653_v45 = vpop.permute.xlu1 %1652 }
 0x4de   : > { %v1661_v48 = vsel %vm1660_vm5, %v1659_v47, %v1653_v45 }
 0x4e6   : > { %v1657_v49 = vpop.permute.xlu1 %1656 }
 0x4e7   : > { %v1663_v50 = vsel %vm1662_vm6, %v1661_v48, %v1657_v49 }
 0x4e8   : > { %v1664_v51 = vpack.c.bf16 %v1663_v50, %v1663_v50 }
 0x4ea   : > { %3177 = vmatmul.mubr.msk.bf16.vlgmr.msra.gmra.mrb[20].mxu1 %vm1161_vm2, %v1664_v51 }
 0x4eb   : > { %3192 = vmatprep.mubr.msk.bf16.mxu1 %vm3559_vm1, %v3558_v3  ;;  %3189 = vmatpush3.bf16.msra.mxu1 %v3370_v1 }
 0x4ec   : > { %3190 = vmatprep.subr.bf16.mxu1 %v3558_v3 }
 0x4ef   : > { %3191 = vmatpush3.bf16.msra.mxu1 %v3371_v2 }
 0x4f0   : > { %3202 = vmatprep.subr.bf16.mxu1 %v3558_v3 }
 0x5bd   : > { %v1725_v53 = vpop.f32.mrb[20].mxu1 }
 0x5be   : > { %v1726_v54 = vadd.f32 %v3009_v52, %v1725_v53  ;;  %v3178_v55 = vpop.f32.mrb[21].mxu1 }
 0x5bf   : > { %v1728_v56 = vpop.f32.mrb[22].mxu1 }
 0x5c0   : > { %v3179_v57 = vpop.f32.mrb[23].mxu1  ;;  %v1733_v58 = vadd.f32 %v1726_v54, %v3978_v5  ;;  %v1137_v5 = vpack.c.bf16 %v4084_v4, %v4084_v4 }
 0x5c2   : > { %v1734_v59 = vsel %vm1161_vm2, %v1733_v58, 0.0  ;;  %3193 = vmatmul.mubr.msk.bf16.vlgmr.msra.gmra.mrb[24].mxu1 %vm1161_vm2, %v1137_v5 }
 0x5c3   : > { %1735 = vadd.xlane.f32.xlu0 %v1734_v59  ;;  %3204 = vmatprep.mubr.msk.bf16.mxu1 %vm3559_vm1, %v3558_v3 }
 0x650   : > { %v1736_v60 = vpop.xlane.xlu0 %1735 }
 0x651   : > { %v1738_v61 = vmul.f32 0.03125, %v1736_v60 }
 0x653   : > { %v1739_v62 = vsub.f32 %v1733_v58, %v1738_v61 }
 0x655   : > { %v1740_v63 = vmul.f32 %v1739_v62, %v1739_v62 }
 0x657   : > { %v1741_v0 = vsel %vm1161_vm2, %v1740_v63, 0.0 }
 0x658   : > { %1742 = vadd.xlane.f32.xlu1 %v1741_v0 }
 0x695   : > { %v1890_v19 = vpop.f32.mrb[24].mxu1 }
 0x696   : > { %v1891_v20 = vadd.f32 %v3019_v18, %v1890_v19  ;;  %v3194_v21 = vpop.f32.mrb[25].mxu1 }
 0x697   : > { %v1893_v22 = vpop.f32.mrb[26].mxu1 }
 0x698   : > { %v4118_v23 = vpack.c.bf16 %v1891_v20, %v1891_v20  ;;  %v3195_v24 = vpop.f32.mrb[27].mxu1 }
 0x69a   : > { %2007 = vrot.lane.b32.xlu0 %v4118_v23, %s3560_s26  ;;  %v1901_v25 = vsel %vm1209_vm3, %v4118_v23, 0 }
 0x69e   : > { %2117 = vrot.lane.b32.xlu0 %v4118_v23, %s3565_s22 }
 0x6a2   : > { %2227 = vrot.lane.b32.xlu0 %v4118_v23, %s3566_s27 }
 0x6e5   : > { %v1743_v8 = vpop.xlane.xlu1 %1742 }
 0x6e6   : > { %v1744_v9 = vmul.f32 0.03125, %v1743_v8 }
 0x6e8   : > { %v1745_v10 = vadd.f32 1e-05, %v1744_v9 }
 0x6ea   : > { %3398 = vrsqrt.f32 %v1745_v10 }
 0x6f4   : > { %v3399_v11 = vpop.eup %3398 }
 0x6f5   : > { %v1747_v13 = vmul.f32 %v3399_v11, %v1739_v62 }
 0x6f7   : > { %v1754_v15 = vmul.f32 %v3013_v12, %v1747_v13 }
 0x6f9   : > { %v4106_v16 = vadd.f32 %v3014_v14, %v1754_v15 }
 0x6fb   : > { %v1762_v17 = vpack.c.bf16 %v4106_v16, %v4106_v16 }
 0x6fd   : > { %3185 = vmatmul.mubr.msk.bf16.vlgmr.msra.gmra.mrb[16].mxu0 %vm1161_vm2, %v1762_v17 }
 0x6fe   : > { %3198 = vmatprep.mubr.msk.bf16.mxu0 %vm3559_vm1, %v3558_v3  ;;  %3197 = vmatpush3.bf16.xpose.msra.mxu0 %v1901_v25 }
 0x6ff   : > { %3208 = vmatprep.subr.bf16.mxu0 %v3558_v3 }
 0x70c   : > { %v2008_v31 = vpop.permute.xlu0 %2007 }
 0x70d   : > { %v2013_v34 = vsel %vm1209_vm3, %v2008_v31, 0 }
 0x710   : > { %v2118_v35 = vpop.permute.xlu0 %2117 }
 0x711   : > { %v2123_v37 = vsel %vm1209_vm3, %v2118_v35, 0 }
 0x714   : > { %v2228_v39 = vpop.permute.xlu0 %2227 }
 0x715   : > { %v2233_v41 = vsel %vm1209_vm3, %v2228_v39, 0  ;;  %v3374_v39 = vld [vmem:[%s3920_s7] sm:$0xff]  }
 0x7d0   : > { %v1823_v27 = vpop.f32.mrb[16].mxu0 }
 0x7d1   : > { %v1824_v28 = vadd.f32 %v3015_v26, %v1823_v27  ;;  %v3186_v29 = vpop.f32.mrb[17].mxu0 }
 0x7d2   : > { %v1826_v30 = vpop.f32.mrb[18].mxu0 }
 0x7d3   : > { %v1829_v32 = vpack.c.bf16 %v1824_v28, %v1824_v28  ;;  %v3187_v33 = vpop.f32.mrb[19].mxu0 }
 0x7d5   : > { %2005 = vrot.lane.b32.xlu1 %v1829_v32, %s3560_s26  ;;  %3199 = vmatmul.mubr.msk.bf16.vlgmr.msra.gmra.mrb[20].mxu0 %vm1209_vm3, %v1829_v32 }
 0x7d6   : > { %3209 = vmatpush3.bf16.xpose.msra.mxu0 %v2013_v34  ;;  %3210 = vmatprep.mubr.msk.bf16.mxu0 %vm3559_vm1, %v3558_v3 }
 0x7d7   : > { %3220 = vmatprep.subr.bf16.mxu0 %v3558_v3 }
 0x7d9   : > { %2115 = vrot.lane.b32.xlu1 %v1829_v32, %s3565_s22 }
 0x7dd   : > { %2225 = vrot.lane.b32.xlu1 %v1829_v32, %s3566_s27 }
 0x7e1   : > { %1954 = vrot.lane.b32.xlu1 %v4118_v23, %s3561_s5  ;;  %s4408_s5 = scalar_lea.vmem %s4305_s11, %s3876_s1 }
 0x847   : > { %v2006_v36 = vpop.permute.xlu1 %2005 }
 0x848   : > { %3211 = vmatmul.mubr.msk.bf16.vlgmr.msra.gmra.mrb[24].mxu0 %vm1209_vm3, %v2006_v36 }
 0x849   : > { %3221 = vmatpush3.bf16.xpose.msra.mxu0 %v2123_v37  ;;  %3222 = vmatprep.mubr.msk.bf16.mxu0 %vm3559_vm1, %v3558_v3 }
 0x84a   : > { %3232 = vmatprep.subr.bf16.mxu0 %v3558_v3 }
 0x84b   : > { %v2116_v38 = vpop.permute.xlu1 %2115 }
 0x84f   : > { %v2226_v40 = vpop.permute.xlu1 %2225 }
 0x850   : > { %3223 = vmatmul.mubr.msk.bf16.vlgmr.msra.gmra.mrb[28].mxu0 %vm1209_vm3, %v2116_v38 }
 0x851   : > { %3233 = vmatpush3.bf16.xpose.msra.mxu0 %v2233_v41  ;;  %3234 = vmatprep.mubr.msk.bf16.mxu0 %vm3559_vm1, %v3558_v3 }
 0x852   : > { %3244 = vmatprep.subr.bf16.mxu0 %v3558_v3 }
 0x853   : > { %v1955_v42 = vpop.permute.xlu1 %1954 }
 0x854   : > { %v1960_v43 = vsel %vm1271_vm4, %v1955_v42, 0 }
 0x855   : > { %3203 = vmatpush3.bf16.msra.mxu1 %v1960_v43 }
 0x856   : > { %3214 = vmatprep.subr.bf16.mxu1 %v3558_v3 }
 0x858   : > { %3235 = vmatmul.mubr.msk.bf16.vlgmr.msra.gmra.mrb[32].mxu0 %vm1209_vm3, %v2226_v40 }
 0x859   : > { %3248 = vmatprep.mubr.msk.bf16.mxu0 %vm3559_vm1, %v3558_v3  ;;  %3245 = vmatpush3.bf16.msra.mxu0 %v3374_v39 }
 0x85a   : > { %3246 = vmatprep.subr.bf16.mxu0 %v3558_v3 }
 0x8a8   : > { %v1937_v44 = vpop.f32.mrb[20].mxu0 }
 0x8a9   : > { %v3200_v45 = vpop.f32.mrb[21].mxu0  ;;  %v1943_v46 = vsel %vm1209_vm3, %v1937_v44, -inf }
 0x8aa   : > { %1944 = vmax.xlane.f32.xlu0 %v1943_v46  ;;  %v1940_v47 = vpop.f32.mrb[22].mxu0 }
 0x8ab   : > { %v3201_v48 = vpop.f32.mrb[23].mxu0  ;;  %v3375_v47 = vld [vmem:[%s3920_s7 + $0x8] sm:$0xff]  }
 0x8ac   : > { %3247 = vmatpush3.bf16.msra.mxu0 %v3375_v47 }
 0x8ad   : > { %3260 = vmatprep.subr.bf16.mxu0 %v3558_v3 }
 0x91b   : > { %v2049_v49 = vpop.f32.mrb[24].mxu0 }
 0x91c   : > { %v3212_v50 = vpop.f32.mrb[25].mxu0  ;;  %v2055_v51 = vsel %vm1209_vm3, %v2049_v49, -inf }
 0x91d   : > { %2056 = vmax.xlane.f32.xlu1 %v2055_v51  ;;  %v2052_v52 = vpop.f32.mrb[26].mxu0 }
 0x91e   : > { %v3213_v53 = vpop.f32.mrb[27].mxu0 }
 0x923   : > { %v2159_v54 = vpop.f32.mrb[28].mxu0 }
 0x924   : > { %v3224_v55 = vpop.f32.mrb[29].mxu0  ;;  %v2165_v56 = vsel %vm1209_vm3, %v2159_v54, -inf }
 0x925   : > { %2166 = vmax.xlane.f32.xlu0 %v2165_v56  ;;  %v2162_v57 = vpop.f32.mrb[30].mxu0 }
 0x926   : > { %v3225_v58 = vpop.f32.mrb[31].mxu0 }
 0x92b   : > { %v2269_v59 = vpop.f32.mrb[32].mxu0 }
 0x92c   : > { %v3236_v60 = vpop.f32.mrb[33].mxu0  ;;  %v2275_v61 = vsel %vm1209_vm3, %v2269_v59, -inf }
 0x92d   : > { %2276 = vmax.xlane.f32.xlu0 %v2275_v61  ;;  %v2272_v62 = vpop.f32.mrb[34].mxu0 }
 0x92e   : > { %2175 = vrot.lane.b32.xlu1 %v4118_v23, %s3562_s3  ;;  %v3237_v63 = vpop.f32.mrb[35].mxu0  ;;  %s4409_s3 = sld [smem:[#allocation19_spill]] }
 0x932   : > { %2285 = vrot.lane.b32.xlu1 %v4118_v23, %s3564_s30 }
 0x937   : > { %v1945_v0 = vpop.xlane.xlu0 %1944 }
 0x938   : > { %v1946_v1 = vsub.f32 %v1937_v44, %v1945_v0 }
 0x93a   : > { %v1947_v2 = vmul.f32 1.442695, %v1946_v1 }
 0x93c   : > { %3400 = vpow2.f32 %v1947_v2 }
 0x943   : > { %2065 = vrot.lane.b32.xlu0 %v4118_v23, %s3563_s8  ;;  %s4410_s8 = sld [smem:[#allocation23_spill]] }
 0x946   : > { %v3401_v5 = vpop.eup %3400 }
 0x947   : > { %v1952_v6 = vpack.c.bf16 %v3401_v5, %v3401_v5  ;;  %v1949_v31 = vsel %vm1209_vm3, %v3401_v5, 0.0 }
 0x949   : > { %3205 = vmatmul.mubr.msk.bf16.vlgmr.msra.gmra.mrb[28].mxu1 %vm1209_vm3, %v1952_v6 }
 0x94a   : > { %3216 = vmatprep.mubr.msk.bf16.mxu1 %vm3559_vm1, %v3558_v3 }
 0x9aa   : > { %v2057_v7 = vpop.xlane.xlu1 %2056 }
 0x9ab   : > { %v2058_v8 = vsub.f32 %v2049_v49, %v2057_v7 }
 0x9ad   : > { %v2059_v9 = vmul.f32 1.442695, %v2058_v8  ;;  %v3031_v8 = vld [vmem:[%s4408_s5] ss:$0 sm:$0xff]  ;;  %s4418_s5 = sld [smem:[#allocation11_spill]] }
 0x9ae   : > { %v2176_v21 = vpop.permute.xlu1 %2175 }
 0x9af   : > { %3402 = vpow2.f32 %v2059_v9  ;;  %v2181_v25 = vsel %vm1271_vm4, %v2176_v21, 0 }
 0x9b2   : > { %v2167_v10 = vpop.xlane.xlu0 %2166  ;;  %v2286_v26 = vpop.permute.xlu1 %2285 }
 0x9b3   : > { %v2168_v11 = vsub.f32 %v2159_v54, %v2167_v10  ;;  %v2291_v30 = vsel %vm1271_vm4, %v2286_v26, 0  ;;  %p3049_p8 = scmp.ne.s32.totalorder %s4418_s5, 1 }
 0x9b4   : > { %s4420_s30 = sld [smem:[#allocation42_spill]] (!%p3049_p8) }
 0x9b5   : > { %v2169_v12 = vmul.f32 1.442695, %v2168_v11 }
 0x9b7   : > { %3404 = vpow2.f32 %v2169_v12 }
 0x9b9   : > { %v3403_v13 = vpop.eup %3402 }
 0x9ba   : > { %v2277_v14 = vpop.xlane.xlu0 %2276  ;;  %v2061_v15 = vsel %vm1209_vm3, %v3403_v13, 0.0  ;;  %v2064_v23 = vpack.c.bf16 %v3403_v13, %v3403_v13 }
 0x9bb   : > { %v2278_v17 = vsub.f32 %v2269_v59, %v2277_v14  ;;  %2062 = vadd.xlane.f32.xlu0 %v2061_v15 }
 0x9bd   : > { %v2279_v18 = vmul.f32 1.442695, %v2278_v17 }
 0x9be   : > { %v2066_v19 = vpop.permute.xlu0 %2065 }
 0x9bf   : > { %3406 = vpow2.f32 %v2279_v18  ;;  %v2071_v20 = vsel %vm1271_vm4, %v2066_v19, 0 }
 0x9c0   : > { %3215 = vmatpush3.bf16.msra.mxu1 %v2071_v20 }
 0x9c1   : > { %v3405_v22 = vpop.eup %3404  ;;  %3226 = vmatprep.subr.bf16.mxu1 %v3558_v3 }
 0x9c2   : > { %v2171_v24 = vsel %vm1209_vm3, %v3405_v22, 0.0  ;;  %v2174_v28 = vpack.c.bf16 %v3405_v22, %v3405_v22  ;;  %v3376_v22 = vld [vmem:[%s4409_s3] sm:$0xff]  }
 0x9c3   : > { %2172 = vadd.xlane.f32.xlu1 %v2171_v24  ;;  %3217 = vmatmul.mubr.msk.bf16.vlgmr.msra.gmra.mrb[32].mxu1 %vm1209_vm3, %v2064_v23  ;;  %v3377_v23 = vld [vmem:[%s4409_s3 + $0x8] sm:$0xff]  }
 0x9c4   : > { %3227 = vmatpush3.bf16.msra.mxu1 %v2181_v25  ;;  %3228 = vmatprep.mubr.msk.bf16.mxu1 %vm3559_vm1, %v3558_v3  ;;  %v3379_v24 = vld [vmem:[%s4410_s8 + $0x8] sm:$0xff]  }
 0x9c5   : > { %3238 = vmatprep.subr.bf16.mxu1 %v3558_v3 }
 0x9c9   : > { %v3407_v27 = vpop.eup %3406 }
 0x9ca   : > { %v2281_v29 = vsel %vm1209_vm3, %v3407_v27, 0.0  ;;  %v2284_v32 = vpack.c.bf16 %v3407_v27, %v3407_v27 }
 0x9cb   : > { %2282 = vadd.xlane.f32.xlu0 %v2281_v29  ;;  %3229 = vmatmul.mubr.msk.bf16.vlgmr.msra.gmra.mrb[36].mxu1 %vm1209_vm3, %v2174_v28  ;;  %v3035_v29 = vld [vmem:[%s1110_s24] ss:$0 sm:$0xff] }
 0x9cc   : > { %3239 = vmatpush3.bf16.msra.mxu1 %v2291_v30  ;;  %3240 = vmatprep.mubr.msk.bf16.mxu1 %vm3559_vm1, %v3558_v3 }
 0x9cd   : > { %3252 = vmatprep.subr.bf16.mxu1 %v3558_v3 }
 0x9cf   : > { %1950 = vadd.xlane.f32.xlu0 %v1949_v31  ;;  %v3036_v31 = vld [vmem:[%s1113_s6] ss:$0 sm:$0xff] }
 0x9d3   : > { %3241 = vmatmul.mubr.msk.bf16.vlgmr.msra.gmra.mrb[40].mxu1 %vm1209_vm3, %v2284_v32 }
 0x9d4   : > { %3256 = vmatprep.mubr.msk.bf16.mxu1 %vm3559_vm1, %v3558_v3  ;;  %3253 = vmatpush3.bf16.msra.mxu1 %v3376_v22 }
 0x9d5   : > { %3254 = vmatprep.subr.bf16.mxu1 %v3558_v3 }
 0x9d8   : > { %3255 = vmatpush3.bf16.msra.mxu1 %v3377_v23 }
 0xa1c   : > { %v1996_v33 = vpop.f32.mrb[28].mxu1 }
 0xa1d   : > { %v3206_v34 = vpop.f32.mrb[29].mxu1 }
 0xa1e   : > { %v1999_v35 = vpop.f32.mrb[30].mxu1 }
 0xa1f   : > { %v3207_v36 = vpop.f32.mrb[31].mxu1  ;;  %v3380_v35 = vld [vmem:[%s4410_s8 + $0x10] sm:$0xff]  }
 0xa20   : > { %v3381_v36 = vld [vmem:[%s4410_s8 + $0x18] sm:$0xff]  }
 0xa48   : > { %v2063_v37 = vpop.xlane.xlu0 %2062 }
 0xa49   : > { %3408 = vrcp.f32 %v2063_v37  ;;  %v3037_v37 = vld [vmem:[%s4413_s23] ss:$0 sm:$0xff] }
 0xa50   : > { %v2173_v38 = vpop.xlane.xlu1 %2172 }
 0xa51   : > { %3410 = vrcp.f32 %v2173_v38 }
 0xa53   : > { %v3409_v40 = vpop.eup %3408 }
 0xa58   : > { %v2283_v45 = vpop.xlane.xlu0 %2282 }
 0xa59   : > { %3412 = vrcp.f32 %v2283_v45 }
 0xa5b   : > { %v3411_v48 = vpop.eup %3410 }
 0xa5c   : > { %v1951_v60 = vpop.xlane.xlu0 %1950 }
 0xa5d   : > { %3414 = vrcp.f32 %v1951_v60 }
 0xa63   : > { %v3413_v54 = vpop.eup %3412 }
 0xa67   : > { %v3415_v61 = vpop.eup %3414 }
 0xa68   : > { %v2003_v63 = vmul.f32 %v3415_v61, %v1996_v33  ;;  %v3047_v61 = vld [vmem:[%s1116_s21] ss:$0 sm:$0xff] }
 0xa96   : > { %v2107_v41 = vpop.f32.mrb[32].mxu1 }
 0xa97   : > { %v2114_v42 = vmul.f32 %v3409_v40, %v2107_v41  ;;  %v3218_v43 = vpop.f32.mrb[33].mxu1 }
 0xa98   : > { %v2110_v44 = vpop.f32.mrb[34].mxu1 }
 0xa99   : > { %2336 = vrot.lane.b32.xlu1 %v2114_v42, %s3571_s28  ;;  %v3219_v46 = vpop.f32.mrb[35].mxu1 }
 0xa9e   : > { %v2217_v49 = vpop.f32.mrb[36].mxu1 }
 0xa9f   : > { %v2224_v50 = vmul.f32 %v3411_v48, %v2217_v49  ;;  %v3230_v51 = vpop.f32.mrb[37].mxu1 }
 0xaa0   : > { %v2220_v52 = vpop.f32.mrb[38].mxu1 }
 0xaa1   : > { %2340 = vrot.lane.b32.xlu0 %v2224_v50, %s3572_s10  ;;  %v3231_v53 = vpop.f32.mrb[39].mxu1 }
 0xaa6   : > { %v2327_v55 = vpop.f32.mrb[40].mxu1 }
 0xaa7   : > { %v2334_v56 = vmul.f32 %v3413_v54, %v2327_v55  ;;  %v3242_v57 = vpop.f32.mrb[41].mxu1 }
 0xaa8   : > { %v2330_v58 = vpop.f32.mrb[42].mxu1 }
 0xaa9   : > { %2344 = vrot.lane.b32.xlu1 %v2334_v56, %s3573_s13  ;;  %v3243_v59 = vpop.f32.mrb[43].mxu1 }
 0xb0b   : > { %v2337_v62 = vpop.permute.xlu1 %2336 }
 0xb0c   : > { %v2347_v1 = vsel %vm1209_vm3, %v2003_v63, %v2337_v62  ;;  %v3048_v63 = vld [vmem:[%s1119_s2] ss:$0 sm:$0xff]  ;;  %s4419_s2 = sld [smem:[#allocation41_spill]] (!%p3049_p8) }
 0xb13   : > { %v2341_v0 = vpop.permute.xlu0 %2340 }
 0xb14   : > { %v2348_v2 = vsel %vm1660_vm5, %v2347_v1, %v2341_v0 }
 0xb1b   : > { %v2345_v5 = vpop.permute.xlu1 %2344 }
 0xb1c   : > { %v2349_v6 = vsel %vm1662_vm6, %v2348_v2, %v2345_v5 }
 0xb1d   : > { %v2350_v7 = vpack.c.bf16 %v2349_v6, %v2349_v6 }
 0xb1f   : > { %3249 = vmatmul.mubr.msk.bf16.vlgmr.msra.gmra.mrb[36].mxu0 %vm1161_vm2, %v2350_v7 }
 0xb20   : > { %3268 = vmatprep.mubr.msk.bf16.mxu0 %vm3559_vm1, %v3558_v3 }
 0xbf2   : > { %v2411_v9 = vpop.f32.mrb[36].mxu0 }
 0xbf3   : > { %v2412_v10 = vadd.f32 %v3031_v8, %v2411_v9  ;;  %v3250_v11 = vpop.f32.mrb[37].mxu0 }
 0xbf4   : > { %v2414_v12 = vpop.f32.mrb[38].mxu0 }
 0xbf5   : > { %v3251_v13 = vpop.f32.mrb[39].mxu0  ;;  %v2419_v14 = vadd.f32 %v2412_v10, %v4106_v16  ;;  %v3378_v16 = vld [vmem:[%s4410_s8] sm:$0xff]  }
 0xbf6   : > { %3261 = vmatpush3.bf16.msra.mxu0 %v3378_v16 }
 0xbf7   : > { %v2420_v15 = vsel %vm1161_vm2, %v2419_v14, 0.0  ;;  %3262 = vmatprep.subr.bf16.mxu0 %v3558_v3 }
 0xbf8   : > { %2421 = vadd.xlane.f32.xlu1 %v2420_v15 }
 0xbfa   : > { %3263 = vmatpush3.bf16.msra.mxu0 %v3379_v24 }
 0xbfb   : > { %3264 = vmatprep.subr.bf16.mxu0 %v3558_v3 }
 0xbfe   : > { %3265 = vmatpush3.bf16.msra.mxu0 %v3380_v35 }
 0xbff   : > { %3266 = vmatprep.subr.bf16.mxu0 %v3558_v3  ;;  %v3041_v3 = vld [vmem:[%s4415_s20] ss:$0 sm:$0xff] }
 0xc02   : > { %3267 = vmatpush3.bf16.msra.mxu0 %v3381_v36 }
 0xc85   : > { %v2422_v17 = vpop.xlane.xlu1 %2421 }
 0xc86   : > { %v2423_v18 = vmul.f32 0.03125, %v2422_v17  ;;  %v3050_v17 = vld [vmem:[%s4419_s2] ss:$0 sm:$0xff] (!%p3049_p8) }
 0xc88   : > { %v2424_v19 = vsub.f32 %v2419_v14, %v2423_v18 }
 0xc8a   : > { %v2425_v20 = vmul.f32 %v2424_v19, %v2424_v19 }
 0xc8c   : > { %v2426_v21 = vsel %vm1161_vm2, %v2425_v20, 0.0 }
 0xc8d   : > { %2427 = vadd.xlane.f32.xlu0 %v2426_v21 }
 0xd1a   : > { %v2428_v25 = vpop.xlane.xlu0 %2427 }
 0xd1b   : > { %v2429_v26 = vmul.f32 0.03125, %v2428_v25 }
 0xd1d   : > { %v2430_v27 = vadd.f32 1e-05, %v2429_v26 }
 0xd1f   : > { %3416 = vrsqrt.f32 %v2430_v27 }
 0xd29   : > { %v3417_v28 = vpop.eup %3416 }
 0xd2a   : > { %v2432_v30 = vmul.f32 %v3417_v28, %v2424_v19  ;;  %v3051_v19 = vld [vmem:[%s4420_s30] ss:$0 sm:$0xff] (!%p3049_p8) }
 0xd2c   : > { %v2439_v32 = vmul.f32 %v3035_v29, %v2432_v30 }
 0xd2e   : > { %v2446_v33 = vadd.f32 %v3036_v31, %v2439_v32 }
 0xd30   : > { %v2447_v34 = vpack.c.bf16 %v2446_v33, %v2446_v33 }
 0xd32   : > { %3257 = vmatmul.mubr.msk.bf16.vlgmr.msra.gmra.mrb[44].mxu1 %vm1161_vm2, %v2447_v34 }
 0xe05   : > { %v2508_v38 = vpop.f32.mrb[44].mxu1 }
 0xe06   : > { %v2509_v39 = vadd.f32 %v3037_v37, %v2508_v38  ;;  %v3258_v40 = vpop.f32.mrb[45].mxu1 }
 0xe07   : > { %v2511_v41 = vpop.f32.mrb[46].mxu1 }
 0xe08   : > { %v2514_v42 = vmax.f32 %v2509_v39, 0.0  ;;  %v3259_v43 = vpop.f32.mrb[47].mxu1 }
 0xe0a   : > { %v2515_v44 = vpack.c.bf16 %v2514_v42, %v2514_v42 }
 0xe0c   : > { %3269 = vmatmul.mubr.msk.bf16.vlgmr.msra.gmra.mrb[40].mxu0 %vm2555_vm7, %v2515_v44 }
 0xedf   : > { %v2593_v45 = vpop.f32.mrb[40].mxu0 }
 0xee0   : > { %v2594_v46 = vadd.f32 %v3041_v3, %v2593_v45  ;;  %v3270_v47 = vpop.f32.mrb[41].mxu0 }
 0xee1   : > { %v2596_v48 = vpop.f32.mrb[42].mxu0 }
 0xee2   : > { %v3271_v49 = vpop.f32.mrb[43].mxu0  ;;  %v2601_v50 = vadd.f32 %v2594_v46, %v2446_v33 }
 0xee4   : > { %v2602_v51 = vsel %vm1161_vm2, %v2601_v50, 0.0 }
 0xee5   : > { %2603 = vadd.xlane.f32.xlu0 %v2602_v51 }
 0xf72   : > { %v2604_v52 = vpop.xlane.xlu0 %2603 }
 0xf73   : > { %v2605_v53 = vmul.f32 0.03125, %v2604_v52 }
 0xf75   : > { %v2606_v54 = vsub.f32 %v2601_v50, %v2605_v53 }
 0xf77   : > { %v2607_v55 = vmul.f32 %v2606_v54, %v2606_v54 }
 0xf79   : > { %v2608_v56 = vsel %vm1161_vm2, %v2607_v55, 0.0 }
 0xf7a   : > { %2609 = vadd.xlane.f32.xlu1 %v2608_v56 }
0x1007   : > { %v2610_v57 = vpop.xlane.xlu1 %2609 }
0x1008   : > { %v2611_v58 = vmul.f32 0.03125, %v2610_v57 }
0x100a   : > { %v2612_v59 = vadd.f32 1e-05, %v2611_v58 }
0x100c   : > { %3418 = vrsqrt.f32 %v2612_v59 }
0x1016   : > { %v3419_v60 = vpop.eup %3418 }
0x1017   : > { %v2614_v62 = vmul.f32 %v3419_v60, %v2606_v54 }
0x1019   : > { %v2621_v0 = vmul.f32 %v3047_v61, %v2614_v62 }
0x101b   : > { %v2628_v1 = vadd.f32 %v3048_v63, %v2621_v0  ;;  %2639 = sbr.rel (%p3049_p8) target bundleno = 4447 (0x115f), region = 132 }
0x101d   : > { %2629 = vst.msk [vmem:[%s3967_s29] sm:$0xff] %vm1161_vm2, %v2628_v1  ;;  %v2631_v2 = vrot.slane %v2628_v1, 1 }
0x101f   : > { %v2633_v5 = vadd.f32 %v2631_v2, %v4084_v4 }
0x1021   : > { %2635 = vst.msk [vmem:[#allocation2] sm:$0x7f] %vm2634_vm8, %v2633_v5 }
0x1024   : > { %v2640_v6 = vld [vmem:[%s3967_s29] sm:$0xff] }
0x1025   : > { %v2643_v7 = vsel %vm1161_vm2, %v2640_v6, 0.0 }
0x1026   : > { %2644 = vadd.xlane.f32.xlu0 %v2643_v7 }
0x10b3   : > { %v2645_v8 = vpop.xlane.xlu0 %2644 }
0x10b4   : > { %v2646_v9 = vmul.f32 0.03125, %v2645_v8 }
0x10b6   : > { %v2647_v10 = vsub.f32 %v2640_v6, %v2646_v9 }
0x10b8   : > { %v2648_v11 = vmul.f32 %v2647_v10, %v2647_v10 }
0x10ba   : > { %v2649_v12 = vsel %vm1161_vm2, %v2648_v11, 0.0 }
0x10bb   : > { %2650 = vadd.xlane.f32.xlu0 %v2649_v12 }
0x1148   : > { %v2651_v13 = vpop.xlane.xlu0 %2650 }
0x1149   : > { %v2652_v14 = vmul.f32 0.03125, %v2651_v13 }
0x114b   : > { %v2653_v4 = vadd.f32 1e-05, %v2652_v14 }
0x114d   : > { %3420 = vrsqrt.f32 %v2653_v4 }
0x1157   : > { %v3421_v15 = vpop.eup %3420 }
0x1158   : > { %v2655_v18 = vmul.f32 %v3421_v15, %v2647_v10 }
0x115a   : > { %v2662_v20 = vmul.f32 %v3050_v17, %v2655_v18 }
0x115c   : > { %v2669_v21 = vadd.f32 %v3051_v19, %v2662_v20 }
0x115e   : > { %2670 = vst.msk [vmem:[%s3967_s29] sm:$0xff] %vm1161_vm2, %v2669_v21 }
0x115f PF: > { %s4421_s22 = sld [smem:[#allocation14_spill]]  ;;  %s4422_s5 = sld [smem:[#allocation9_spill]] }
0x1160   : > { %s4423_s26 = sld [smem:[#allocation10_spill]]  ;;  %s4424_s27 = sld [smem:[#allocation17_spill]] }
0x1161   : > { %s4425_s28 = sld [smem:[#allocation12_spill]]  ;;  %s4426_s6 = sld [smem:[#allocation13_spill]] }
0x1162   : > { %s4427_s2 = sld [smem:[#allocation15_spill]]  ;;  %s4428_s29 = sld [smem:[#allocation16_spill]] }
0x1165   : > { %s40_s0 = sadd.s32 1, %s4421_s22  }
0x1166   : > { %p37_p4 = scmp.ge.s32.totalorder %s40_s0, 6  }
0x1168   :  { %39 = sbr.rel (!%p37_p4) target bundleno = 28 (0x1c), region = 237 }
0x116f   :  { %2690 = vsyncpa [#allocation4], 1 }
0x1170   :  { %2692 = vsyncpa [#allocation4 + $0x1], 1 }
0x1171   :  { %2693 = vsyncpa [#allocation6], 1 }
0x1172   :  { %2695 = vsyncpa [#allocation6 + $0x1], 1 }

</bundles_post_ra>
